<compile_context>
chip_gen: v7x
topology: tpu7x:2x2x1
jax: 0.10.0
libtpu: 0.0.40
codegen_flags: <defaults>
</compile_context>

<pallas_src>
import jax
import jax.numpy as jnp
from jax import lax
from jax.experimental import pallas as pl
from jax.experimental.pallas import tpu as pltpu


# ---------------------------------------------------------------------------
# Kernel
# ---------------------------------------------------------------------------
def make_mapping_kernel(n_layers: int, scales):
    """scales: python list of per-layer equalized-lr scales (static)."""

    def kernel(x_ref, w_ref, b_ref, o_ref):
        x = x_ref[...].astype(jnp.float32)                        # (tb, ins) f32

        # PixelNorm: x / sqrt(mean(x^2, feature) + 1e-8)   (XLU reduce + EUP rsqrt)
        mean_sq = jnp.mean(x * x, axis=1, keepdims=True) + 1e-8    # (tb, 1)
        x = x * lax.rsqrt(mean_sq)

        # Fully unrolled serial layer chain (keep Python `for`: gives the LLO
        # scheduler visibility to hide the VPU epilogue under the MXU).
        for l in range(n_layers):
            if l > 0:
                x = jnp.maximum(x, 0.0)
            # Fold the equalized-lr scale into the small activation tile, cast
            # only the matmul operand to bf16 (MXU-native, v5e-safe).
            xs = (x * scales[l]).astype(jnp.bfloat16)              # (tb, K)
            w = w_ref[l]                                           # (K, N) bf16
            b = b_ref[l].astype(jnp.float32)                       # (N,)
            x = jnp.dot(xs, w, preferred_element_type=jnp.float32) + b[None, :]

        o_ref[...] = x.astype(o_ref.dtype)

    return kernel


# ---------------------------------------------------------------------------
# Wrapper
# ---------------------------------------------------------------------------
def _device_kind() -> str:
    try:
        return jax.devices()[0].device_kind.lower()
    except Exception:  # pragma: no cover - CPU / interpret fallback
        return ""


def _pick_tb(B: int) -> int:
    """Generation-aware batch tile; always >=2 grid steps when B >= 16."""
    kind = _device_kind()
    is_v5e = ("v5e" in kind) or ("v5 lite" in kind) or ("v5lite" in kind)
    # tb=256 fills the MXU M dim on v6e/v7x (2x256^2); v5e (128^2) caps at 256
    # too but 128 is already a full pass there.  512 intentionally excluded
    # (f32 activation spills around each dot).
    prefs = (256, 128) if is_v5e else (256, 128)
    for cand in prefs:
        if B % cand == 0 and B // cand >= 2:
            return cand
    if B >= 16:
        # Largest multiple of 8 dividing B with at least 2 grid steps.
        tb = (B // 2) // 8 * 8
        while tb >= 8:
            if B % tb == 0:
                return tb
            tb -= 8
    return B


def mapping_net(x, weights, biases, *, lr_mul=0.01, tb=None):
    """x: (B, ins) f32; weights: (L, outs, ins) (PyTorch F.linear layout);
    biases: (L, outs)."""
    B, ins = x.shape
    L, outs, ins_w = weights.shape
    assert ins_w == ins
    # Stacked weights imply every layer is ins -> outs with ins == outs.
    assert outs == ins, "stacked (L, outs, ins) weights require ins == outs"

    if tb is None:
        tb = _pick_tb(B)
    assert B % tb == 0
    assert tb == B or tb % 8 == 0, "batch tile must be a multiple of 8"

    # Per-layer equalized-lr scale (layer 0 uses fan_in = ins, rest use outs).
    scales = [(2.0 / ins) ** 0.5 * lr_mul] + [(2.0 / outs) ** 0.5 * lr_mul] * (L - 1)

    # Hoisted once in the wrapper: (L, outs, ins) -> (L, ins, outs), bf16.
    # TODO(synk): keep layer-0 weights in f32 if tighter-than-bf16 parity with
    # the PyTorch f32 reference is ever required.
    w_t = jnp.transpose(weights, (0, 2, 1)).astype(jnp.bfloat16)
    b_f32 = biases.astype(jnp.float32)

    kernel = make_mapping_kernel(L, scales)

    # ---- VMEM budget (single-buffered weights after Buffered(1)) ----
    # Note: on v7x each TensorCore holds its own copy of the weight stack, so
    # chip-wide usage is ~2x w_bytes; per-core (what vmem_limit governs) is 1x.
    kind = _device_kind()
    is_v7x = "v7" in kind
    w_bytes = L * ins * outs * 2                       # bf16, single buffer
    b_bytes = L * outs * 4                             # f32, single buffer
    x_bytes = tb * ins * x.dtype.itemsize              # double-buffered
    o_bytes = tb * outs * x.dtype.itemsize             # double-buffered
    needed = w_bytes + b_bytes + 2 * (x_bytes + o_bytes) + (4 << 20)
    cap = (48 << 20) if is_v7x else (96 << 20)
    vmem_limit = int(min(max(needed, 16 << 20), cap))

    flops = 2 * B * (ins * outs + (L - 1) * outs * outs)
    bytes_accessed = (B * ins * x.dtype.itemsize + B * outs * x.dtype.itemsize
                      + w_bytes + b_bytes)
    cost = pl.CostEstimate(flops=flops, transcendentals=B,
                           bytes_accessed=bytes_accessed)

    def build_and_call(single_buffer_weights: bool):
        if single_buffer_weights:
            w_spec = pl.BlockSpec((L, ins, outs), lambda i: (0, 0, 0),
                                  pipeline_mode=pl.Buffered(1))
            b_spec = pl.BlockSpec((L, outs), lambda i: (0, 0),
                                  pipeline_mode=pl.Buffered(1))
        else:
            w_spec = pl.BlockSpec((L, ins, outs), lambda i: (0, 0, 0))
            b_spec = pl.BlockSpec((L, outs), lambda i: (0, 0))

        call = pl.pallas_call(
            kernel,
            out_shape=jax.ShapeDtypeStruct((B, outs), x.dtype),
            grid_spec=pltpu.PrefetchScalarGridSpec(
                num_scalar_prefetch=0,
                grid=(B // tb,),
                in_specs=[
                    pl.BlockSpec((tb, ins), lambda i: (i, 0)),
                    w_spec,   # grid-invariant weight stack
                    b_spec,   # grid-invariant bias stack
                ],
                out_specs=pl.BlockSpec((tb, outs), lambda i: (i, 0)),
            ),
            compiler_params=pltpu.CompilerParams(
                dimension_semantics=("parallel",),
                vmem_limit_bytes=vmem_limit,
            ),
            cost_estimate=cost,
        )
        return call(x, w_t, b_f32)

    try:
        return build_and_call(True)
    except Exception:
        # Conservative fallback: default double-buffered specs (correctness
        # identical; only costs a bit more VMEM).
        return build_and_call(False)


# ---------------------------------------------------------------------------
# Pure-JAX f32 reference mirroring the PyTorch forward
# ---------------------------------------------------------------------------
def mapping_net_ref(x, weights, biases, lr_mul=0.01):
    ins = x.shape[1]
    L, outs, _ = weights.shape
    x_ = jnp.mean(x * x, axis=1, keepdims=True) + 1e-8
    x = x / jnp.sqrt(x_)
    for l in range(L):
        if l > 0:
            x = jnp.maximum(x, 0.0)
        fan_in = ins if l == 0 else outs
        scale = (2.0 / fan_in) ** 0.5 * lr_mul
        x = x @ (weights[l] * scale).T + biases[l]
    return x


if __name__ == "__main__":
    # Small shapes consistent with the module forward (b * z_dim -> b * w_dim).
    # B=16 so the batch grid has >=2 parallel steps (tb=8).
    B, INS, OUTS, N_LAYERS = 16, 128, 128, 8

    key = jax.random.PRNGKey(0)
    kx, kw, kb = jax.random.split(key, 3)

    x = jax.random.normal(kx, (B, INS), dtype=jnp.float32)
    # torch.randn(outs, ins) per layer, stacked; biases nonzero to exercise the
    # bias-add path (module initializes them to zeros, but semantics are same).
    weights = jax.random.normal(kw, (N_LAYERS, OUTS, INS), dtype=jnp.float32)
    biases = 0.1 * jax.random.normal(kb, (N_LAYERS, OUTS), dtype=jnp.float32)

    out = jax.block_until_ready(mapping_net(x, weights, biases))
    ref = mapping_net_ref(x, weights, biases)

    assert out.shape == (B, OUTS)
    # Kernel uses bf16 matmul operands (f32 accumulation); compare with a
    # relative-L2 check against the f32 reference.
    rel_err = jnp.linalg.norm(out - ref) / (jnp.linalg.norm(ref) + 1e-30)
    assert float(rel_err) < 3e-2, f"mismatch vs reference: rel_err={float(rel_err)}"

    print("KERNEL_OK")
</pallas_src>

<mosaic_0001>
module attributes {stable_mosaic.version = 11 : i64} {
  func.func @kernel(%arg0: i32, %arg1: memref<8x128xf32, #tpu.memory_space<vmem>>, %arg2: memref<8x128x128xbf16, #tpu.memory_space<vmem>>, %arg3: memref<8x128xf32, #tpu.memory_space<vmem>>, %arg4: memref<8x128xf32, #tpu.memory_space<vmem>>) attributes {dimension_semantics = [#tpu.dimension_semantics<parallel>], iteration_bounds = array<i64: 2>, scalar_prefetch = 0 : i64, scratch_operands = 0 : i64, tpu.core_type = #tpu.core_type<tc>, window_params = [{transform_indices = @transform_0, window_bounds = array<i64: 8, 128>}, {pipeline_mode = #tpu.pipeline_mode<synchronous>, transform_indices = @transform_1, window_bounds = array<i64: 8, 128, 128>}, {pipeline_mode = #tpu.pipeline_mode<synchronous>, transform_indices = @transform_2, window_bounds = array<i64: 8, 128>}, {transform_indices = @transform_3, window_bounds = array<i64: 8, 128>}]} {
    %c0 = arith.constant 0 : index
    %c0_0 = arith.constant 0 : index
    %0 = vector.load %arg1[%c0, %c0_0] : memref<8x128xf32, #tpu.memory_space<vmem>>, vector<8x128xf32>
    %1 = arith.mulf %0, %0 : vector<8x128xf32>
    %cst = arith.constant dense<0.000000e+00> : vector<8xf32>
    %2 = vector.multi_reduction <add>, %1, %cst [1] : vector<8x128xf32> to vector<8xf32>
    %3 = vector.shape_cast %2 : vector<8xf32> to vector<8x1xf32>
    %cst_1 = arith.constant 1.280000e+02 : f32
    %4 = vector.broadcast %cst_1 : f32 to vector<8x1xf32>
    %5 = arith.divf %3, %4 : vector<8x1xf32>
    %cst_2 = arith.constant 9.99999993E-9 : f32
    %6 = vector.broadcast %cst_2 : f32 to vector<8x1xf32>
    %7 = arith.addf %5, %6 : vector<8x1xf32>
    %8 = math.rsqrt %7 : vector<8x1xf32>
    %9 = vector.broadcast %8 : vector<8x1xf32> to vector<8x128xf32>
    %10 = arith.mulf %0, %9 : vector<8x128xf32>
    %cst_3 = arith.constant 1.250000e-03 : f32
    %11 = vector.broadcast %cst_3 : f32 to vector<8x128xf32>
    %12 = arith.mulf %10, %11 : vector<8x128xf32>
    %13 = arith.truncf %12 : vector<8x128xf32> to vector<8x128xbf16>
    %c0_4 = arith.constant 0 : index
    %c0_5 = arith.constant 0 : index
    %c0_6 = arith.constant 0 : index
    %14 = vector.load %arg2[%c0_4, %c0_5, %c0_6] : memref<8x128x128xbf16, #tpu.memory_space<vmem>>, vector<1x128x128xbf16>
    %15 = vector.shape_cast %14 : vector<1x128x128xbf16> to vector<128x128xbf16>
    %c0_7 = arith.constant 0 : index
    %c0_8 = arith.constant 0 : index
    %16 = vector.load %arg3[%c0_7, %c0_8] : memref<8x128xf32, #tpu.memory_space<vmem>>, vector<1x128xf32>
    %17 = vector.shape_cast %16 : vector<1x128xf32> to vector<128xf32>
    %cst_9 = arith.constant dense<0.000000e+00> : vector<8x128xf32>
    %18 = tpu.matmul %13, %15, %cst_9 {dimension_numbers = #tpu.dot_dimension_numbers<[1], [0], [0], [1], [0, 0, 1, 1], [], []>} : vector<8x128xbf16>, vector<128x128xbf16>, vector<8x128xf32> -> vector<8x128xf32>
    %19 = vector.shape_cast %17 : vector<128xf32> to vector<1x128xf32>
    %20 = vector.broadcast %19 : vector<1x128xf32> to vector<8x128xf32>
    %21 = arith.addf %18, %20 : vector<8x128xf32>
    %cst_10 = arith.constant 0.000000e+00 : f32
    %22 = vector.broadcast %cst_10 : f32 to vector<8x128xf32>
    %23 = arith.maximumf %21, %22 : vector<8x128xf32>
    %cst_11 = arith.constant 1.250000e-03 : f32
    %24 = vector.broadcast %cst_11 : f32 to vector<8x128xf32>
    %25 = arith.mulf %23, %24 : vector<8x128xf32>
    %26 = arith.truncf %25 : vector<8x128xf32> to vector<8x128xbf16>
    %c1 = arith.constant 1 : index
    %c0_12 = arith.constant 0 : index
    %c0_13 = arith.constant 0 : index
    %27 = vector.load %arg2[%c1, %c0_12, %c0_13] : memref<8x128x128xbf16, #tpu.memory_space<vmem>>, vector<1x128x128xbf16>
    %28 = vector.shape_cast %27 : vector<1x128x128xbf16> to vector<128x128xbf16>
    %c1_14 = arith.constant 1 : index
    %c0_15 = arith.constant 0 : index
    %29 = vector.load %arg3[%c1_14, %c0_15] : memref<8x128xf32, #tpu.memory_space<vmem>>, vector<1x128xf32>
    %30 = vector.shape_cast %29 : vector<1x128xf32> to vector<128xf32>
    %cst_16 = arith.constant dense<0.000000e+00> : vector<8x128xf32>
    %31 = tpu.matmul %26, %28, %cst_16 {dimension_numbers = #tpu.dot_dimension_numbers<[1], [0], [0], [1], [0, 0, 1, 1], [], []>} : vector<8x128xbf16>, vector<128x128xbf16>, vector<8x128xf32> -> vector<8x128xf32>
    %32 = vector.shape_cast %30 : vector<128xf32> to vector<1x128xf32>
    %33 = vector.broadcast %32 : vector<1x128xf32> to vector<8x128xf32>
    %34 = arith.addf %31, %33 : vector<8x128xf32>
    %cst_17 = arith.constant 0.000000e+00 : f32
    %35 = vector.broadcast %cst_17 : f32 to vector<8x128xf32>
    %36 = arith.maximumf %34, %35 : vector<8x128xf32>
    %cst_18 = arith.constant 1.250000e-03 : f32
    %37 = vector.broadcast %cst_18 : f32 to vector<8x128xf32>
    %38 = arith.mulf %36, %37 : vector<8x128xf32>
    %39 = arith.truncf %38 : vector<8x128xf32> to vector<8x128xbf16>
    %c2 = arith.constant 2 : index
    %c0_19 = arith.constant 0 : index
    %c0_20 = arith.constant 0 : index
    %40 = vector.load %arg2[%c2, %c0_19, %c0_20] : memref<8x128x128xbf16, #tpu.memory_space<vmem>>, vector<1x128x128xbf16>
    %41 = vector.shape_cast %40 : vector<1x128x128xbf16> to vector<128x128xbf16>
    %c2_21 = arith.constant 2 : index
    %c0_22 = arith.constant 0 : index
    %42 = vector.load %arg3[%c2_21, %c0_22] : memref<8x128xf32, #tpu.memory_space<vmem>>, vector<1x128xf32>
    %43 = vector.shape_cast %42 : vector<1x128xf32> to vector<128xf32>
    %cst_23 = arith.constant dense<0.000000e+00> : vector<8x128xf32>
    %44 = tpu.matmul %39, %41, %cst_23 {dimension_numbers = #tpu.dot_dimension_numbers<[1], [0], [0], [1], [0, 0, 1, 1], [], []>} : vector<8x128xbf16>, vector<128x128xbf16>, vector<8x128xf32> -> vector<8x128xf32>
    %45 = vector.shape_cast %43 : vector<128xf32> to vector<1x128xf32>
    %46 = vector.broadcast %45 : vector<1x128xf32> to vector<8x128xf32>
    %47 = arith.addf %44, %46 : vector<8x128xf32>
    %cst_24 = arith.constant 0.000000e+00 : f32
    %48 = vector.broadcast %cst_24 : f32 to vector<8x128xf32>
    %49 = arith.maximumf %47, %48 : vector<8x128xf32>
    %cst_25 = arith.constant 1.250000e-03 : f32
    %50 = vector.broadcast %cst_25 : f32 to vector<8x128xf32>
    %51 = arith.mulf %49, %50 : vector<8x128xf32>
    %52 = arith.truncf %51 : vector<8x128xf32> to vector<8x128xbf16>
    %c3 = arith.constant 3 : index
    %c0_26 = arith.constant 0 : index
    %c0_27 = arith.constant 0 : index
    %53 = vector.load %arg2[%c3, %c0_26, %c0_27] : memref<8x128x128xbf16, #tpu.memory_space<vmem>>, vector<1x128x128xbf16>
    %54 = vector.shape_cast %53 : vector<1x128x128xbf16> to vector<128x128xbf16>
    %c3_28 = arith.constant 3 : index
    %c0_29 = arith.constant 0 : index
    %55 = vector.load %arg3[%c3_28, %c0_29] : memref<8x128xf32, #tpu.memory_space<vmem>>, vector<1x128xf32>
    %56 = vector.shape_cast %55 : vector<1x128xf32> to vector<128xf32>
    %cst_30 = arith.constant dense<0.000000e+00> : vector<8x128xf32>
    %57 = tpu.matmul %52, %54, %cst_30 {dimension_numbers = #tpu.dot_dimension_numbers<[1], [0], [0], [1], [0, 0, 1, 1], [], []>} : vector<8x128xbf16>, vector<128x128xbf16>, vector<8x128xf32> -> vector<8x128xf32>
    %58 = vector.shape_cast %56 : vector<128xf32> to vector<1x128xf32>
    %59 = vector.broadcast %58 : vector<1x128xf32> to vector<8x128xf32>
    %60 = arith.addf %57, %59 : vector<8x128xf32>
    %cst_31 = arith.constant 0.000000e+00 : f32
    %61 = vector.broadcast %cst_31 : f32 to vector<8x128xf32>
    %62 = arith.maximumf %60, %61 : vector<8x128xf32>
    %cst_32 = arith.constant 1.250000e-03 : f32
    %63 = vector.broadcast %cst_32 : f32 to vector<8x128xf32>
    %64 = arith.mulf %62, %63 : vector<8x128xf32>
    %65 = arith.truncf %64 : vector<8x128xf32> to vector<8x128xbf16>
    %c4 = arith.constant 4 : index
    %c0_33 = arith.constant 0 : index
    %c0_34 = arith.constant 0 : index
    %66 = vector.load %arg2[%c4, %c0_33, %c0_34] : memref<8x128x128xbf16, #tpu.memory_space<vmem>>, vector<1x128x128xbf16>
    %67 = vector.shape_cast %66 : vector<1x128x128xbf16> to vector<128x128xbf16>
    %c4_35 = arith.constant 4 : index
    %c0_36 = arith.constant 0 : index
    %68 = vector.load %arg3[%c4_35, %c0_36] : memref<8x128xf32, #tpu.memory_space<vmem>>, vector<1x128xf32>
    %69 = vector.shape_cast %68 : vector<1x128xf32> to vector<128xf32>
    %cst_37 = arith.constant dense<0.000000e+00> : vector<8x128xf32>
    %70 = tpu.matmul %65, %67, %cst_37 {dimension_numbers = #tpu.dot_dimension_numbers<[1], [0], [0], [1], [0, 0, 1, 1], [], []>} : vector<8x128xbf16>, vector<128x128xbf16>, vector<8x128xf32> -> vector<8x128xf32>
    %71 = vector.shape_cast %69 : vector<128xf32> to vector<1x128xf32>
    %72 = vector.broadcast %71 : vector<1x128xf32> to vector<8x128xf32>
    %73 = arith.addf %70, %72 : vector<8x128xf32>
    %cst_38 = arith.constant 0.000000e+00 : f32
    %74 = vector.broadcast %cst_38 : f32 to vector<8x128xf32>
    %75 = arith.maximumf %73, %74 : vector<8x128xf32>
    %cst_39 = arith.constant 1.250000e-03 : f32
    %76 = vector.broadcast %cst_39 : f32 to vector<8x128xf32>
    %77 = arith.mulf %75, %76 : vector<8x128xf32>
    %78 = arith.truncf %77 : vector<8x128xf32> to vector<8x128xbf16>
    %c5 = arith.constant 5 : index
    %c0_40 = arith.constant 0 : index
    %c0_41 = arith.constant 0 : index
    %79 = vector.load %arg2[%c5, %c0_40, %c0_41] : memref<8x128x128xbf16, #tpu.memory_space<vmem>>, vector<1x128x128xbf16>
    %80 = vector.shape_cast %79 : vector<1x128x128xbf16> to vector<128x128xbf16>
    %c5_42 = arith.constant 5 : index
    %c0_43 = arith.constant 0 : index
    %81 = vector.load %arg3[%c5_42, %c0_43] : memref<8x128xf32, #tpu.memory_space<vmem>>, vector<1x128xf32>
    %82 = vector.shape_cast %81 : vector<1x128xf32> to vector<128xf32>
    %cst_44 = arith.constant dense<0.000000e+00> : vector<8x128xf32>
    %83 = tpu.matmul %78, %80, %cst_44 {dimension_numbers = #tpu.dot_dimension_numbers<[1], [0], [0], [1], [0, 0, 1, 1], [], []>} : vector<8x128xbf16>, vector<128x128xbf16>, vector<8x128xf32> -> vector<8x128xf32>
    %84 = vector.shape_cast %82 : vector<128xf32> to vector<1x128xf32>
    %85 = vector.broadcast %84 : vector<1x128xf32> to vector<8x128xf32>
    %86 = arith.addf %83, %85 : vector<8x128xf32>
    %cst_45 = arith.constant 0.000000e+00 : f32
    %87 = vector.broadcast %cst_45 : f32 to vector<8x128xf32>
    %88 = arith.maximumf %86, %87 : vector<8x128xf32>
    %cst_46 = arith.constant 1.250000e-03 : f32
    %89 = vector.broadcast %cst_46 : f32 to vector<8x128xf32>
    %90 = arith.mulf %88, %89 : vector<8x128xf32>
    %91 = arith.truncf %90 : vector<8x128xf32> to vector<8x128xbf16>
    %c6 = arith.constant 6 : index
    %c0_47 = arith.constant 0 : index
    %c0_48 = arith.constant 0 : index
    %92 = vector.load %arg2[%c6, %c0_47, %c0_48] : memref<8x128x128xbf16, #tpu.memory_space<vmem>>, vector<1x128x128xbf16>
    %93 = vector.shape_cast %92 : vector<1x128x128xbf16> to vector<128x128xbf16>
    %c6_49 = arith.constant 6 : index
    %c0_50 = arith.constant 0 : index
    %94 = vector.load %arg3[%c6_49, %c0_50] : memref<8x128xf32, #tpu.memory_space<vmem>>, vector<1x128xf32>
    %95 = vector.shape_cast %94 : vector<1x128xf32> to vector<128xf32>
    %cst_51 = arith.constant dense<0.000000e+00> : vector<8x128xf32>
    %96 = tpu.matmul %91, %93, %cst_51 {dimension_numbers = #tpu.dot_dimension_numbers<[1], [0], [0], [1], [0, 0, 1, 1], [], []>} : vector<8x128xbf16>, vector<128x128xbf16>, vector<8x128xf32> -> vector<8x128xf32>
    %97 = vector.shape_cast %95 : vector<128xf32> to vector<1x128xf32>
    %98 = vector.broadcast %97 : vector<1x128xf32> to vector<8x128xf32>
    %99 = arith.addf %96, %98 : vector<8x128xf32>
    %cst_52 = arith.constant 0.000000e+00 : f32
    %100 = vector.broadcast %cst_52 : f32 to vector<8x128xf32>
    %101 = arith.maximumf %99, %100 : vector<8x128xf32>
    %cst_53 = arith.constant 1.250000e-03 : f32
    %102 = vector.broadcast %cst_53 : f32 to vector<8x128xf32>
    %103 = arith.mulf %101, %102 : vector<8x128xf32>
    %104 = arith.truncf %103 : vector<8x128xf32> to vector<8x128xbf16>
    %c7 = arith.constant 7 : index
    %c0_54 = arith.constant 0 : index
    %c0_55 = arith.constant 0 : index
    %105 = vector.load %arg2[%c7, %c0_54, %c0_55] : memref<8x128x128xbf16, #tpu.memory_space<vmem>>, vector<1x128x128xbf16>
    %106 = vector.shape_cast %105 : vector<1x128x128xbf16> to vector<128x128xbf16>
    %c7_56 = arith.constant 7 : index
    %c0_57 = arith.constant 0 : index
    %107 = vector.load %arg3[%c7_56, %c0_57] : memref<8x128xf32, #tpu.memory_space<vmem>>, vector<1x128xf32>
    %108 = vector.shape_cast %107 : vector<1x128xf32> to vector<128xf32>
    %cst_58 = arith.constant dense<0.000000e+00> : vector<8x128xf32>
    %109 = tpu.matmul %104, %106, %cst_58 {dimension_numbers = #tpu.dot_dimension_numbers<[1], [0], [0], [1], [0, 0, 1, 1], [], []>} : vector<8x128xbf16>, vector<128x128xbf16>, vector<8x128xf32> -> vector<8x128xf32>
    %110 = vector.shape_cast %108 : vector<128xf32> to vector<1x128xf32>
    %111 = vector.broadcast %110 : vector<1x128xf32> to vector<8x128xf32>
    %112 = arith.addf %109, %111 : vector<8x128xf32>
    %c0_59 = arith.constant 0 : index
    %c0_60 = arith.constant 0 : index
    %113 = vector.load %arg4[%c0_59, %c0_60] : memref<8x128xf32, #tpu.memory_space<vmem>>, vector<8x128xf32>
    tpu.vector_store %arg4[%c0_59, %c0_60], %112 {strides = array<i32>} : memref<8x128xf32, #tpu.memory_space<vmem>>, vector<8x128xf32>,
    return
  }
  func.func @transform_0(%arg0: i32) -> (i32, i32) {
    %c0_i32 = arith.constant 0 : i32
    %c0_i32_0 = arith.constant 0 : i32
    return %arg0, %c0_i32 : i32, i32
  }
  func.func @transform_1(%arg0: i32) -> (i32, i32, i32) {
    %c0_i32 = arith.constant 0 : i32
    %c0_i32_0 = arith.constant 0 : i32
    %c0_i32_1 = arith.constant 0 : i32
    %c0_i32_2 = arith.constant 0 : i32
    return %c0_i32, %c0_i32_0, %c0_i32_1 : i32, i32, i32
  }
  func.func @transform_2(%arg0: i32) -> (i32, i32) {
    %c0_i32 = arith.constant 0 : i32
    %c0_i32_0 = arith.constant 0 : i32
    %c0_i32_1 = arith.constant 0 : i32
    return %c0_i32, %c0_i32_0 : i32, i32
  }
  func.func @transform_3(%arg0: i32) -> (i32, i32) {
    %c0_i32 = arith.constant 0 : i32
    %c0_i32_0 = arith.constant 0 : i32
    return %arg0, %c0_i32 : i32, i32
  }
}

module attributes {stable_mosaic.version = 11 : i64} {
  func.func @kernel(%arg0: i32, %arg1: memref<8x128xf32, #tpu.memory_space<vmem>>, %arg2: memref<8x128x128xbf16, #tpu.memory_space<vmem>>, %arg3: memref<8x128xf32, #tpu.memory_space<vmem>>, %arg4: memref<8x128xf32, #tpu.memory_space<vmem>>) attributes {dimension_semantics = [#tpu.dimension_semantics<parallel>], iteration_bounds = array<i64: 2>, scalar_prefetch = 0 : i64, scratch_operands = 0 : i64, tpu.core_type = #tpu.core_type<tc>, window_params = [{transform_indices = @transform_0, window_bounds = array<i64: 8, 128>}, {pipeline_mode = #tpu.pipeline_mode<synchronous>, transform_indices = @transform_1, window_bounds = array<i64: 8, 128, 128>}, {pipeline_mode = #tpu.pipeline_mode<synchronous>, transform_indices = @transform_2, window_bounds = array<i64: 8, 128>}, {transform_indices = @transform_3, window_bounds = array<i64: 8, 128>}]} {
    %c0 = arith.constant 0 : index
    %c0_0 = arith.constant 0 : index
    %0 = vector.load %arg1[%c0, %c0_0] : memref<8x128xf32, #tpu.memory_space<vmem>>, vector<8x128xf32>
    %1 = arith.mulf %0, %0 : vector<8x128xf32>
    %cst = arith.constant dense<0.000000e+00> : vector<8xf32>
    %2 = vector.multi_reduction <add>, %1, %cst [1] : vector<8x128xf32> to vector<8xf32>
    %3 = vector.shape_cast %2 : vector<8xf32> to vector<8x1xf32>
    %cst_1 = arith.constant 1.280000e+02 : f32
    %4 = vector.broadcast %cst_1 : f32 to vector<8x1xf32>
    %5 = arith.divf %3, %4 : vector<8x1xf32>
    %cst_2 = arith.constant 9.99999993E-9 : f32
    %6 = vector.broadcast %cst_2 : f32 to vector<8x1xf32>
    %7 = arith.addf %5, %6 : vector<8x1xf32>
    %8 = math.rsqrt %7 : vector<8x1xf32>
    %9 = vector.broadcast %8 : vector<8x1xf32> to vector<8x128xf32>
    %10 = arith.mulf %0, %9 : vector<8x128xf32>
    %cst_3 = arith.constant 1.250000e-03 : f32
    %11 = vector.broadcast %cst_3 : f32 to vector<8x128xf32>
    %12 = arith.mulf %10, %11 : vector<8x128xf32>
    %13 = arith.truncf %12 : vector<8x128xf32> to vector<8x128xbf16>
    %c0_4 = arith.constant 0 : index
    %c0_5 = arith.constant 0 : index
    %c0_6 = arith.constant 0 : index
    %14 = vector.load %arg2[%c0_4, %c0_5, %c0_6] : memref<8x128x128xbf16, #tpu.memory_space<vmem>>, vector<1x128x128xbf16>
    %15 = vector.shape_cast %14 : vector<1x128x128xbf16> to vector<128x128xbf16>
    %c0_7 = arith.constant 0 : index
    %c0_8 = arith.constant 0 : index
    %16 = vector.load %arg3[%c0_7, %c0_8] : memref<8x128xf32, #tpu.memory_space<vmem>>, vector<1x128xf32>
    %17 = vector.shape_cast %16 : vector<1x128xf32> to vector<128xf32>
    %cst_9 = arith.constant dense<0.000000e+00> : vector<8x128xf32>
    %18 = tpu.matmul %13, %15, %cst_9 {dimension_numbers = #tpu.dot_dimension_numbers<[1], [0], [0], [1], [0, 0, 1, 1], [], []>} : vector<8x128xbf16>, vector<128x128xbf16>, vector<8x128xf32> -> vector<8x128xf32>
    %19 = vector.shape_cast %17 : vector<128xf32> to vector<1x128xf32>
    %20 = vector.broadcast %19 : vector<1x128xf32> to vector<8x128xf32>
    %21 = arith.addf %18, %20 : vector<8x128xf32>
    %cst_10 = arith.constant 0.000000e+00 : f32
    %22 = vector.broadcast %cst_10 : f32 to vector<8x128xf32>
    %23 = arith.maximumf %21, %22 : vector<8x128xf32>
    %cst_11 = arith.constant 1.250000e-03 : f32
    %24 = vector.broadcast %cst_11 : f32 to vector<8x128xf32>
    %25 = arith.mulf %23, %24 : vector<8x128xf32>
    %26 = arith.truncf %25 : vector<8x128xf32> to vector<8x128xbf16>
    %c1 = arith.constant 1 : index
    %c0_12 = arith.constant 0 : index
    %c0_13 = arith.constant 0 : index
    %27 = vector.load %arg2[%c1, %c0_12, %c0_13] : memref<8x128x128xbf16, #tpu.memory_space<vmem>>, vector<1x128x128xbf16>
    %28 = vector.shape_cast %27 : vector<1x128x128xbf16> to vector<128x128xbf16>
    %c1_14 = arith.constant 1 : index
    %c0_15 = arith.constant 0 : index
    %29 = vector.load %arg3[%c1_14, %c0_15] : memref<8x128xf32, #tpu.memory_space<vmem>>, vector<1x128xf32>
    %30 = vector.shape_cast %29 : vector<1x128xf32> to vector<128xf32>
    %cst_16 = arith.constant dense<0.000000e+00> : vector<8x128xf32>
    %31 = tpu.matmul %26, %28, %cst_16 {dimension_numbers = #tpu.dot_dimension_numbers<[1], [0], [0], [1], [0, 0, 1, 1], [], []>} : vector<8x128xbf16>, vector<128x128xbf16>, vector<8x128xf32> -> vector<8x128xf32>
    %32 = vector.shape_cast %30 : vector<128xf32> to vector<1x128xf32>
    %33 = vector.broadcast %32 : vector<1x128xf32> to vector<8x128xf32>
    %34 = arith.addf %31, %33 : vector<8x128xf32>
    %cst_17 = arith.constant 0.000000e+00 : f32
    %35 = vector.broadcast %cst_17 : f32 to vector<8x128xf32>
    %36 = arith.maximumf %34, %35 : vector<8x128xf32>
    %cst_18 = arith.constant 1.250000e-03 : f32
    %37 = vector.broadcast %cst_18 : f32 to vector<8x128xf32>
    %38 = arith.mulf %36, %37 : vector<8x128xf32>
    %39 = arith.truncf %38 : vector<8x128xf32> to vector<8x128xbf16>
    %c2 = arith.constant 2 : index
    %c0_19 = arith.constant 0 : index
    %c0_20 = arith.constant 0 : index
    %40 = vector.load %arg2[%c2, %c0_19, %c0_20] : memref<8x128x128xbf16, #tpu.memory_space<vmem>>, vector<1x128x128xbf16>
    %41 = vector.shape_cast %40 : vector<1x128x128xbf16> to vector<128x128xbf16>
    %c2_21 = arith.constant 2 : index
    %c0_22 = arith.constant 0 : index
    %42 = vector.load %arg3[%c2_21, %c0_22] : memref<8x128xf32, #tpu.memory_space<vmem>>, vector<1x128xf32>
    %43 = vector.shape_cast %42 : vector<1x128xf32> to vector<128xf32>
    %cst_23 = arith.constant dense<0.000000e+00> : vector<8x128xf32>
    %44 = tpu.matmul %39, %41, %cst_23 {dimension_numbers = #tpu.dot_dimension_numbers<[1], [0], [0], [1], [0, 0, 1, 1], [], []>} : vector<8x128xbf16>, vector<128x128xbf16>, vector<8x128xf32> -> vector<8x128xf32>
    %45 = vector.shape_cast %43 : vector<128xf32> to vector<1x128xf32>
    %46 = vector.broadcast %45 : vector<1x128xf32> to vector<8x128xf32>
    %47 = arith.addf %44, %46 : vector<8x128xf32>
    %cst_24 = arith.constant 0.000000e+00 : f32
    %48 = vector.broadcast %cst_24 : f32 to vector<8x128xf32>
    %49 = arith.maximumf %47, %48 : vector<8x128xf32>
    %cst_25 = arith.constant 1.250000e-03 : f32
    %50 = vector.broadcast %cst_25 : f32 to vector<8x128xf32>
    %51 = arith.mulf %49, %50 : vector<8x128xf32>
    %52 = arith.truncf %51 : vector<8x128xf32> to vector<8x128xbf16>
    %c3 = arith.constant 3 : index
    %c0_26 = arith.constant 0 : index
    %c0_27 = arith.constant 0 : index
    %53 = vector.load %arg2[%c3, %c0_26, %c0_27] : memref<8x128x128xbf16, #tpu.memory_space<vmem>>, vector<1x128x128xbf16>
    %54 = vector.shape_cast %53 : vector<1x128x128xbf16> to vector<128x128xbf16>
    %c3_28 = arith.constant 3 : index
    %c0_29 = arith.constant 0 : index
    %55 = vector.load %arg3[%c3_28, %c0_29] : memref<8x128xf32, #tpu.memory_space<vmem>>, vector<1x128xf32>
    %56 = vector.shape_cast %55 : vector<1x128xf32> to vector<128xf32>
    %cst_30 = arith.constant dense<0.000000e+00> : vector<8x128xf32>
    %57 = tpu.matmul %52, %54, %cst_30 {dimension_numbers = #tpu.dot_dimension_numbers<[1], [0], [0], [1], [0, 0, 1, 1], [], []>} : vector<8x128xbf16>, vector<128x128xbf16>, vector<8x128xf32> -> vector<8x128xf32>
    %58 = vector.shape_cast %56 : vector<128xf32> to vector<1x128xf32>
    %59 = vector.broadcast %58 : vector<1x128xf32> to vector<8x128xf32>
    %60 = arith.addf %57, %59 : vector<8x128xf32>
    %cst_31 = arith.constant 0.000000e+00 : f32
    %61 = vector.broadcast %cst_31 : f32 to vector<8x128xf32>
    %62 = arith.maximumf %60, %61 : vector<8x128xf32>
    %cst_32 = arith.constant 1.250000e-03 : f32
    %63 = vector.broadcast %cst_32 : f32 to vector<8x128xf32>
    %64 = arith.mulf %62, %63 : vector<8x128xf32>
    %65 = arith.truncf %64 : vector<8x128xf32> to vector<8x128xbf16>
    %c4 = arith.constant 4 : index
    %c0_33 = arith.constant 0 : index
    %c0_34 = arith.constant 0 : index
    %66 = vector.load %arg2[%c4, %c0_33, %c0_34] : memref<8x128x128xbf16, #tpu.memory_space<vmem>>, vector<1x128x128xbf16>
    %67 = vector.shape_cast %66 : vector<1x128x128xbf16> to vector<128x128xbf16>
    %c4_35 = arith.constant 4 : index
    %c0_36 = arith.constant 0 : index
    %68 = vector.load %arg3[%c4_35, %c0_36] : memref<8x128xf32, #tpu.memory_space<vmem>>, vector<1x128xf32>
    %69 = vector.shape_cast %68 : vector<1x128xf32> to vector<128xf32>
    %cst_37 = arith.constant dense<0.000000e+00> : vector<8x128xf32>
    %70 = tpu.matmul %65, %67, %cst_37 {dimension_numbers = #tpu.dot_dimension_numbers<[1], [0], [0], [1], [0, 0, 1, 1], [], []>} : vector<8x128xbf16>, vector<128x128xbf16>, vector<8x128xf32> -> vector<8x128xf32>
    %71 = vector.shape_cast %69 : vector<128xf32> to vector<1x128xf32>
    %72 = vector.broadcast %71 : vector<1x128xf32> to vector<8x128xf32>
    %73 = arith.addf %70, %72 : vector<8x128xf32>
    %cst_38 = arith.constant 0.000000e+00 : f32
    %74 = vector.broadcast %cst_38 : f32 to vector<8x128xf32>
    %75 = arith.maximumf %73, %74 : vector<8x128xf32>
    %cst_39 = arith.constant 1.250000e-03 : f32
    %76 = vector.broadcast %cst_39 : f32 to vector<8x128xf32>
    %77 = arith.mulf %75, %76 : vector<8x128xf32>
    %78 = arith.truncf %77 : vector<8x128xf32> to vector<8x128xbf16>
    %c5 = arith.constant 5 : index
    %c0_40 = arith.constant 0 : index
    %c0_41 = arith.constant 0 : index
    %79 = vector.load %arg2[%c5, %c0_40, %c0_41] : memref<8x128x128xbf16, #tpu.memory_space<vmem>>, vector<1x128x128xbf16>
    %80 = vector.shape_cast %79 : vector<1x128x128xbf16> to vector<128x128xbf16>
    %c5_42 = arith.constant 5 : index
    %c0_43 = arith.constant 0 : index
    %81 = vector.load %arg3[%c5_42, %c0_43] : memref<8x128xf32, #tpu.memory_space<vmem>>, vector<1x128xf32>
    %82 = vector.shape_cast %81 : vector<1x128xf32> to vector<128xf32>
    %cst_44 = arith.constant dense<0.000000e+00> : vector<8x128xf32>
    %83 = tpu.matmul %78, %80, %cst_44 {dimension_numbers = #tpu.dot_dimension_numbers<[1], [0], [0], [1], [0, 0, 1, 1], [], []>} : vector<8x128xbf16>, vector<128x128xbf16>, vector<8x128xf32> -> vector<8x128xf32>
    %84 = vector.shape_cast %82 : vector<128xf32> to vector<1x128xf32>
    %85 = vector.broadcast %84 : vector<1x128xf32> to vector<8x128xf32>
    %86 = arith.addf %83, %85 : vector<8x128xf32>
    %cst_45 = arith.constant 0.000000e+00 : f32
    %87 = vector.broadcast %cst_45 : f32 to vector<8x128xf32>
    %88 = arith.maximumf %86, %87 : vector<8x128xf32>
    %cst_46 = arith.constant 1.250000e-03 : f32
    %89 = vector.broadcast %cst_46 : f32 to vector<8x128xf32>
    %90 = arith.mulf %88, %89 : vector<8x128xf32>
    %91 = arith.truncf %90 : vector<8x128xf32> to vector<8x128xbf16>
    %c6 = arith.constant 6 : index
    %c0_47 = arith.constant 0 : index
    %c0_48 = arith.constant 0 : index
    %92 = vector.load %arg2[%c6, %c0_47, %c0_48] : memref<8x128x128xbf16, #tpu.memory_space<vmem>>, vector<1x128x128xbf16>
    %93 = vector.shape_cast %92 : vector<1x128x128xbf16> to vector<128x128xbf16>
    %c6_49 = arith.constant 6 : index
    %c0_50 = arith.constant 0 : index
    %94 = vector.load %arg3[%c6_49, %c0_50] : memref<8x128xf32, #tpu.memory_space<vmem>>, vector<1x128xf32>
    %95 = vector.shape_cast %94 : vector<1x128xf32> to vector<128xf32>
    %cst_51 = arith.constant dense<0.000000e+00> : vector<8x128xf32>
    %96 = tpu.matmul %91, %93, %cst_51 {dimension_numbers = #tpu.dot_dimension_numbers<[1], [0], [0], [1], [0, 0, 1, 1], [], []>} : vector<8x128xbf16>, vector<128x128xbf16>, vector<8x128xf32> -> vector<8x128xf32>
    %97 = vector.shape_cast %95 : vector<128xf32> to vector<1x128xf32>
    %98 = vector.broadcast %97 : vector<1x128xf32> to vector<8x128xf32>
    %99 = arith.addf %96, %98 : vector<8x128xf32>
    %cst_52 = arith.constant 0.000000e+00 : f32
    %100 = vector.broadcast %cst_52 : f32 to vector<8x128xf32>
    %101 = arith.maximumf %99, %100 : vector<8x128xf32>
    %cst_53 = arith.constant 1.250000e-03 : f32
    %102 = vector.broadcast %cst_53 : f32 to vector<8x128xf32>
    %103 = arith.mulf %101, %102 : vector<8x128xf32>
    %104 = arith.truncf %103 : vector<8x128xf32> to vector<8x128xbf16>
    %c7 = arith.constant 7 : index
    %c0_54 = arith.constant 0 : index
    %c0_55 = arith.constant 0 : index
    %105 = vector.load %arg2[%c7, %c0_54, %c0_55] : memref<8x128x128xbf16, #tpu.memory_space<vmem>>, vector<1x128x128xbf16>
    %106 = vector.shape_cast %105 : vector<1x128x128xbf16> to vector<128x128xbf16>
    %c7_56 = arith.constant 7 : index
    %c0_57 = arith.constant 0 : index
    %107 = vector.load %arg3[%c7_56, %c0_57] : memref<8x128xf32, #tpu.memory_space<vmem>>, vector<1x128xf32>
    %108 = vector.shape_cast %107 : vector<1x128xf32> to vector<128xf32>
    %cst_58 = arith.constant dense<0.000000e+00> : vector<8x128xf32>
    %109 = tpu.matmul %104, %106, %cst_58 {dimension_numbers = #tpu.dot_dimension_numbers<[1], [0], [0], [1], [0, 0, 1, 1], [], []>} : vector<8x128xbf16>, vector<128x128xbf16>, vector<8x128xf32> -> vector<8x128xf32>
    %110 = vector.shape_cast %108 : vector<128xf32> to vector<1x128xf32>
    %111 = vector.broadcast %110 : vector<1x128xf32> to vector<8x128xf32>
    %112 = arith.addf %109, %111 : vector<8x128xf32>
    %c0_59 = arith.constant 0 : index
    %c0_60 = arith.constant 0 : index
    %113 = vector.load %arg4[%c0_59, %c0_60] : memref<8x128xf32, #tpu.memory_space<vmem>>, vector<8x128xf32>
    tpu.vector_store %arg4[%c0_59, %c0_60], %112 {strides = array<i32>} : memref<8x128xf32, #tpu.memory_space<vmem>>, vector<8x128xf32>,
    return
  }
  func.func @transform_0(%arg0: i32) -> (i32, i32) {
    %c0_i32 = arith.constant 0 : i32
    %c0_i32_0 = arith.constant 0 : i32
    return %arg0, %c0_i32 : i32, i32
  }
  func.func @transform_1(%arg0: i32) -> (i32, i32, i32) {
    %c0_i32 = arith.constant 0 : i32
    %c0_i32_0 = arith.constant 0 : i32
    %c0_i32_1 = arith.constant 0 : i32
    %c0_i32_2 = arith.constant 0 : i32
    return %c0_i32, %c0_i32_0, %c0_i32_1 : i32, i32, i32
  }
  func.func @transform_2(%arg0: i32) -> (i32, i32) {
    %c0_i32 = arith.constant 0 : i32
    %c0_i32_0 = arith.constant 0 : i32
    %c0_i32_1 = arith.constant 0 : i32
    return %c0_i32, %c0_i32_0 : i32, i32
  }
  func.func @transform_3(%arg0: i32) -> (i32, i32) {
    %c0_i32 = arith.constant 0 : i32
    %c0_i32_0 = arith.constant 0 : i32
    return %arg0, %c0_i32 : i32, i32
  }
}

</mosaic_0001>

<bundles_post_ra>
// kernel: tpu_custom_call.1
= control target key start
LH: loop header
LB: loop body
LE: loop exit
PB: predicated region body
PF: predicated region fallthrough
CT: control target
= control target key end

     0   :  { %8 = vsyncpa [#allocation3], 0  ;;  %s2185_s0 = inlined_call_operand.hbm [shape: f32[16,128], index: 0, kind: input, shape index: {}]   ;;  %s2186_s1 = inlined_call_operand.hbm [shape: bf16[8,128,128], index: 1, kind: input, shape index: {}]   ;;  %s2187_s2 = inlined_call_operand.hbm [shape: f32[8,128], index: 2, kind: input, shape index: {}]   ;;  %s2188_s3 = inlined_call_operand.hbm [shape: f32[16,128], index: 3, kind: output, shape index: {}]  }
   0x1   :  { %10 = vsyncpa [#allocation3 + $0x1], 0 }
   0x2   :  { %11 = vsyncpa [#allocation6], 0 }
   0x3   :  { %12 = vsyncpa [#allocation4], 0 }
   0x4   :  { %14 = vsyncpa [#allocation4 + $0x1], 0  ;;  %s1872_s12 = smov 0   ;;  %s1874_s13 = smov 0  }
   0x5   :  { %s1876_s14 = smov 0   ;;  %s1878_s15 = smov 0  }
   0x6 LB: > { %s1893_s16 = sadd.s32 4294967295, %s1842_s15   ;;  %s1229_s17 = sadd.s32 4294967294, %s1842_s15   ;;  %s1842_s15 = sphi %s1878_s15, %s2208_s15   ;;  %s1838_s14 = sphi %s1876_s14, %s2207_s14   ;;  %s1834_s13 = sphi %s1874_s13, %s2206_s13   ;;  %s1830_s12 = sphi %s1872_s12, %s2205_s12  }
   0x7   : > { %p40_p0 = scmp.ne.s32.totalorder %s1834_s13, %s1830_s12  ;;  %p2189_p1 = scmp.eq.s32.totalorder %s1893_s16, 0 }
   0x8   : > { %p112_p3 = scmp.eq.s32.totalorder %s1229_s17, 1  ;;  %p1230_p5 = scmp.ge.s32.totalorder %s1842_s15, 1 }
   0x9   : > { %p1902_p4 = por %p2189_p1, %p40_p0  ;;  %p119_p7 = scmp.lt.s32.totalorder %s1842_s15, 3 }
   0xa   : > { %p1907_p6 = por %p112_p3, %p40_p0  ;;  %s1844_s21 = smov [#allocation5]  }
   0xb   : > { %s2192_s18 = scalar_select %p1902_p4, 1, 0 }
   0xc   : > { %s2193_s19 = scalar_select %p1907_p6, 1, 0 }
   0xd   : > { %p1912_p8 = pnand %p1230_p5, %p119_p7  ;;  %s131_s22 = sshll.u32 %s1844_s21, 4  ;;  %s1916_s22 = int_to_ptr.vmem [resolvable:$true] %s131_s22 }
   0xe   : > { %s1845_s24 = smov [#allocation7]   ;;  %s1686_s28 = scalar_lea.hbm %s2186_s1, 8192 }
   0xf   : > { %p1561_p9 = pneg %p1912_p8  ;;  %s145_s25 = sshll.u32 %s1845_s24, 4  ;;  %s1927_s25 = int_to_ptr.vmem [resolvable:$true] %s145_s25 }
  0x10   : > { %p1687_p12 = scmp.ne.s32.totalorder %s2186_s1, %s1686_s28  ;;  %p1693_p5 = scmp.lt.u32.totalorder %s1686_s28, %s2186_s1 }
  0x11   : > { %p1923_p11 = pnand %p1561_p9, %p2189_p1 }
  0x13   : > { %p1688_p13 = pneg %p1923_p11 }
  0x15   : > { %p1689_p0 = pnand %p1688_p13, %p1687_p12 }
  0x17   : > { %p1690_p3 = pneg %p1689_p0 }
  0x19   : > { %p1695_p7 = pnand %p1693_p5, %p1690_p3 }
  0x1b   : > { %1698 = shalt.err (!%p1695_p7)
}
  0x1c   : > { %s1699_s6 = scalar_lea.vmem %s1916_s22, 8192  ;;  %p1707_p2 = scmp.lt.s32.totalorder %s1916_s22, %s1916_s22 }
  0x1d   : > { %p1700_p9 = scmp.ne.s32.totalorder %s1916_s22, %s1699_s6  ;;  %p1708_p12 = scmp.lt.s32.totalorder %s1699_s6, %s1699_s6 }
  0x1f   : > { %p1702_p10 = pnand %p1700_p9, %p1688_p13  ;;  %p1709_p0 = por %p1708_p12, %p1707_p2 }
  0x21   : > { %p1703_p1 = pneg %p1702_p10 }
  0x23   : > { %p1710_p6 = pnand %p1709_p0, %p1703_p1 }
  0x25   : > { %1713 = shalt.err (!%p1710_p6)
}
  0x26   : > { %s1846_s7 = smov 64   ;;  %s1847_s8 = smov 4  }
  0x27   : > { %1564 = dma.hbm_to_vmem [thread:$0]  (!%p1923_p11), %s2186_s1, 8192, %s1916_s22, [#allocation6], %s1846_s7, %s1846_s7, %s1847_s8  }
  0x28   : > { %s1714_s21 = scalar_lea.hbm %s2187_s2, 128 }
  0x29   : > { %p1715_p2 = scmp.ne.s32.totalorder %s2187_s2, %s1714_s21  ;;  %p1721_p10 = scmp.lt.u32.totalorder %s1714_s21, %s2187_s2 }
  0x2b   : > { %p1717_p1 = pnand %p1715_p2, %p1688_p13 }
  0x2d   : > { %p1718_p6 = pneg %p1717_p1 }
  0x2f   : > { %p1723_p3 = pnand %p1721_p10, %p1718_p6 }
  0x31   : > { %1726 = shalt.err (!%p1723_p3)
}
  0x32   : > { %s1727_s22 = scalar_lea.vmem %s1927_s25, 128  ;;  %p1735_p12 = scmp.lt.s32.totalorder %s1927_s25, %s1927_s25 }
  0x33   : > { %p1728_p5 = scmp.ne.s32.totalorder %s1927_s25, %s1727_s22  ;;  %p1736_p0 = scmp.lt.s32.totalorder %s1727_s22, %s1727_s22 }
  0x35   : > { %p1730_p7 = pnand %p1728_p5, %p1688_p13  ;;  %p1737_p2 = por %p1736_p0, %p1735_p12 }
  0x37   : > { %p1731_p9 = pneg %p1730_p7 }
  0x39   : > { %p1738_p1 = pnand %p1737_p2, %p1731_p9 }
  0x3b   : > { %1741 = shalt.err (!%p1738_p1)
}
  0x3c   : > { %1567 = dma.hbm_to_vmem [thread:$0]  (!%p1923_p11), %s2187_s2, 128, %s1927_s25, [#allocation6]  }
  0x3d   : > { %s1982_s4 = sadd.s32 1, %s1842_s15   ;;  %s27_s23 = sadd.s32 1, %s1838_s14 }
  0x3e   : > { %s24_s5 = ssub.s32 %s1842_s15, %s1982_s4  ;;  %p34_p13 = scmp.ne.s32.totalorder %s1838_s14, %s1834_s13 }
  0x3f   : > { %p25_p6 = scmp.eq.s32.totalorder %s24_s5, 0  ;;  %p35_p10 = scmp.eq.s32.totalorder %s1842_s15, 0 }
  0x40   : > { %p2196_p3 = scmp.eq.s32.totalorder %s1893_s16, 1  ;;  %p1578_p7 = scmp.lt.s32.totalorder %s1842_s15, 2 }
  0x41   : > { %s1998_s7 = scalar_select %p25_p6, %s1838_s14, %s27_s23  }
  0x42   : > { %p1992_p5 = por %p2196_p3, %p34_p13  ;;  %p36_p9 = por %p35_p10, %p34_p13 }
  0x43   : > { %s156_s8 = sand.u32 1, %s1838_s14   ;;  %s1235_s25 = sshll.u32 %s1842_s15, 7 }
  0x44   : > { %s2197_s6 = scalar_select %p1992_p5, 1, 0 }
  0x45   : > { %s1234_s9 = sshll.u32 %s156_s8, 3  ;;  %s2005_s17 = scalar_lea.hbm %s2185_s0, %s1235_s25 }
  0x46   : > { %s160_s21 = scalar_lea.vmem [#allocation2], %s1234_s9  ;;  %p2009_p11 = pnand %p1578_p7, %p36_p9 }
  0x47   : > { %s167_s24 = sshll.u32 %s160_s21, 4  ;;  %s157_s27 = scalar_lea.sflag [#allocation3], %s156_s8  ;;  %s2007_s24 = int_to_ptr.vmem [resolvable:$true] %s167_s24 }
  0x48   : > { %s1742_s28 = scalar_lea.hbm %s2005_s17, 128  ;;  %p1744_p0 = pneg %p2009_p11 }
  0x49   : > { %p1743_p12 = scmp.ne.s32.totalorder %s2005_s17, %s1742_s28  ;;  %s1747_s30 = scalar_lea.hbm %s2185_s0, 256 }
  0x4a   : > { %p1748_p13 = scmp.lt.u32.totalorder %s2005_s17, %s2185_s0  ;;  %p1749_p6 = scmp.lt.u32.totalorder %s1747_s30, %s1742_s28 }
  0x4b   : > { %p1745_p2 = pnand %p1744_p0, %p1743_p12  ;;  %p1751_p3 = scmp.lt.u32.totalorder %s1742_s28, %s2005_s17 }
  0x4c   : > { %p1750_p10 = por %p1749_p6, %p1748_p13 }
  0x4d   : > { %p1746_p1 = pneg %p1745_p2 }
  0x4e   : > { %p1752_p7 = por %p1751_p3, %p1750_p10 }
  0x50   : > { %p1753_p9 = pnand %p1752_p7, %p1746_p1 }
  0x52   : > { %1756 = shalt.err (!%p1753_p9)
}
  0x53   : > { %s1757_s8 = scalar_lea.vmem %s2007_s24, 128  ;;  %s1848_s9 = smov [#allocation2]  }
  0x54   : > { %p1758_p12 = scmp.ne.s32.totalorder %s2007_s24, %s1757_s8  ;;  %s1762_s25 = sshll.u32 %s1848_s9, 4  ;;  %s1763_s25 = int_to_ptr.vmem [resolvable:$false] %s1762_s25 }
  0x55   : > { %s1764_s10 = scalar_lea.vmem %s1763_s25, 256  ;;  %p1765_p4 = scmp.lt.s32.totalorder %s2007_s24, %s1763_s25 }
  0x56   : > { %p1760_p2 = pnand %p1758_p12, %p1744_p0  ;;  %p1766_p13 = scmp.lt.s32.totalorder %s1764_s10, %s1757_s8 }
  0x58   : > { %p1761_p5 = pneg %p1760_p2  ;;  %p1767_p6 = por %p1766_p13, %p1765_p4 }
  0x5a   : > { %p1768_p10 = pnand %p1767_p6, %p1761_p5 }
  0x5c   : > { %1771 = shalt.err (!%p1768_p10)
}
  0x5d   : > { %1571 = dma.hbm_to_vmem [thread:$0]  (!%p2009_p11), %s2005_s17, 128, %s2007_s24, %s157_s27  }
  0x5e   : > { %176 = sbr.rel (%p1912_p8) target bundleno = 2039 (0x7f7), region = 32  ;;  %s2041_s11 = sand.u32 (!%p1912_p8), 1, %s1834_s13  }
  0x5f   : > { %s1237_s21 = sshll.u32 (!%p1912_p8), %s2041_s11, 3  ;;  %s179_s28 = scalar_lea.sflag (!%p1912_p8), [#allocation3], %s2041_s11 }
  0x60   : > { %s182_s22 = scalar_lea.vmem (!%p1912_p8), [#allocation2], %s1237_s21  ;;  %p2199_p4 = scmp.ne.s32.totalorder (!%p1912_p8), %s2192_s18, 0 }
  0x65   : > { %1817 = dma.done.wait (%p2199_p4), %s179_s28, 128  }
  0x66   : > { %1819 = vsyncadd (%p2199_p4), %s179_s28, 4294967168  ;;  %p2200_p5 = scmp.eq.s32.totalorder %s1893_s16, 0 }
  0x68   : > { %1821 = dma.done.wait (%p2200_p5), [#allocation6], 8320   ;;  %p2201_p8 = pmov %p2200_p5 }
  0x69   : > { %v1849_v0 = vmov 0.0   ;;  %v214_v1 = vld [vmem:[%s182_s22] sm:$0xff]  ;;  %v1620_v3 = vld [vmem:[#allocation5] sm:$0xff]   ;;  %v1621_v4 = vld [vmem:[#allocation5 + $0x8] sm:$0xff]   ;;  %vm1850_vm0 = vmmov 0   ;;  %s1314_s18 = sshll.u32 %s1893_s16, 7 }
  0x6a   : > { %1823 = vsyncadd (%p2201_p8), [#allocation6], 4294958976  ;;  %1389 = vmatprep.subr.bf16.mxu0 %v1849_v0  ;;  %1409 = vmatprep.subr.bf16.mxu1 %v1849_v0  ;;  %v215_v2 = vmul.f32 %v214_v1, %v214_v1  ;;  %v1622_v5 = vld [vmem:[#allocation5 + $0x10] sm:$0xff]   ;;  %v1623_v6 = vld [vmem:[#allocation5 + $0x18] sm:$0xff]   ;;  %s212_s20 = scalar_lea.vmem [#allocation8], %s1237_s21  ;;  %s2141_s27 = scalar_lea.hbm %s2188_s3, %s1314_s18 }
  0x6b   : > { %1390 = vmatpush3.bf16.msra.mxu0 %v1620_v3  ;;  %v1624_v7 = vld [vmem:[#allocation5 + $0x20] sm:$0xff]   ;;  %v1625_v8 = vld [vmem:[#allocation5 + $0x28] sm:$0xff]   ;;  %1405 = vmatprep.mubr.msk.bf16.mxu0 %vm1850_vm0, %v1849_v0  ;;  %v1626_v9 = vld [vmem:[#allocation5 + $0x30] sm:$0xff]   ;;  %s1140_s17 = sshll.u32 %s212_s20, 4  ;;  %s1127_s16 = scalar_lea.sflag [#allocation4], %s2041_s11  ;;  %s2143_s17 = int_to_ptr.vmem [resolvable:$true] %s1140_s17 }
  0x6c   : > { %216 = vadd.xlane.f32.xlu0 %v215_v2  ;;  %1391 = vmatprep.subr.bf16.mxu0 %v1849_v0  ;;  %v1627_v10 = vld [vmem:[#allocation5 + $0x38] sm:$0xff]   ;;  %v1628_v11 = vld [vmem:[#allocation5 + $0x40] sm:$0xff]   ;;  %v1629_v12 = vld [vmem:[#allocation5 + $0x48] sm:$0xff]   ;;  %s1772_s29 = scalar_lea.vmem %s2143_s17, 128  ;;  %p2202_p0 = scmp.ne.s32.totalorder %s2197_s6, 0 }
  0x6d   : > { %1425 = vmatprep.mubr.msk.bf16.mxu1 %vm1850_vm0, %v1849_v0  ;;  %1410 = vmatpush3.bf16.msra.mxu1 %v1628_v11  ;;  %v1630_v13 = vld [vmem:[#allocation5 + $0x50] sm:$0xff]   ;;  %v1631_v14 = vld [vmem:[#allocation5 + $0x58] sm:$0xff]   ;;  %v1632_v15 = vld [vmem:[#allocation5 + $0x60] sm:$0xff]   ;;  %p1773_p11 = scmp.ne.s32.totalorder %s2143_s17, %s1772_s29  ;;  %s1851_s30 = smov [#allocation8]  }
  0x6e   : > { %1411 = vmatprep.subr.bf16.mxu1 %v1849_v0  ;;  %v1633_v16 = vld [vmem:[#allocation5 + $0x68] sm:$0xff]   ;;  %v1634_v24 = vld [vmem:[#allocation5 + $0x70] sm:$0xff]   ;;  %v1635_v25 = vld [vmem:[#allocation5 + $0x78] sm:$0xff]   ;;  %s1776_s23 = sshll.u32 %s1851_s30, 4  ;;  %s1777_s23 = int_to_ptr.vmem [resolvable:$false] %s1776_s23 }
  0x6f   : > { %1392 = vmatpush3.bf16.msra.mxu0 %v1621_v4  ;;  %v1636_v26 = vld [vmem:[#allocation5 + $0x80] sm:$0xff]   ;;  %v1637_v27 = vld [vmem:[#allocation5 + $0x88] sm:$0xff]   ;;  %v1638_v28 = vld [vmem:[#allocation5 + $0x90] sm:$0xff]   ;;  %p1774_p1 = pnand %p1773_p11, %p2202_p0  ;;  %s1778_s5 = scalar_lea.vmem %s1777_s23, 256 }
  0x70   : > { %1393 = vmatprep.subr.bf16.mxu0 %v1849_v0  ;;  %v1639_v29 = vld [vmem:[#allocation5 + $0x98] sm:$0xff]   ;;  %v1640_v30 = vld [vmem:[#allocation5 + $0xa0] sm:$0xff]   ;;  %v1641_v31 = vld [vmem:[#allocation5 + $0xa8] sm:$0xff]   ;;  %p1779_p7 = scmp.lt.s32.totalorder %s2143_s17, %s1777_s23  ;;  %p1780_p9 = scmp.lt.s32.totalorder %s1778_s5, %s1772_s29 }
  0x71   : > { %1412 = vmatpush3.bf16.msra.mxu1 %v1629_v12  ;;  %v1241_v32 = vld [vmem:[#allocation7] ss:$0 sm:$0xff]  ;;  %v1642_v41 = vld [vmem:[#allocation5 + $0xb0] sm:$0xff]   ;;  %v1643_v42 = vld [vmem:[#allocation5 + $0xb8] sm:$0xff]   ;;  %p1775_p3 = pneg %p1774_p1 }
  0x72   : > { %1413 = vmatprep.subr.bf16.mxu1 %v1849_v0  ;;  %v1644_v43 = vld [vmem:[#allocation5 + $0xc0] sm:$0xff]   ;;  %v1645_v44 = vld [vmem:[#allocation5 + $0xc8] sm:$0xff]   ;;  %v1646_v45 = vld [vmem:[#allocation5 + $0xd0] sm:$0xff]   ;;  %p1781_p12 = por %p1780_p9, %p1779_p7 }
  0x73   : > { %1394 = vmatpush3.bf16.msra.mxu0 %v1622_v5  ;;  %v1647_v46 = vld [vmem:[#allocation5 + $0xd8] sm:$0xff]   ;;  %v1648_v47 = vld [vmem:[#allocation5 + $0xe0] sm:$0xff]   ;;  %v1649_v48 = vld [vmem:[#allocation5 + $0xe8] sm:$0xff]  }
  0x74   : > { %1395 = vmatprep.subr.bf16.mxu0 %v1849_v0  ;;  %v1250_v49 = vld [vmem:[#allocation7 + $0x1] ss:$0 sm:$0xff]  ;;  %v1650_v58 = vld [vmem:[#allocation5 + $0xf0] sm:$0xff]   ;;  %v1651_v59 = vld [vmem:[#allocation5 + $0xf8] sm:$0xff]   ;;  %p1782_p2 = pnand %p1781_p12, %p1775_p3 }
  0x75   : > { %1414 = vmatpush3.bf16.msra.mxu1 %v1630_v13  ;;  %v1652_v60 = vld [vmem:[#allocation5 + $0x100] sm:$0xff]   ;;  %v1653_v61 = vld [vmem:[#allocation5 + $0x108] sm:$0xff]   ;;  %v1654_v62 = vld [vmem:[#allocation5 + $0x110] sm:$0xff]  }
  0x76   : > { %1415 = vmatprep.subr.bf16.mxu1 %v1849_v0  ;;  %v1655_v63 = vld [vmem:[#allocation5 + $0x118] sm:$0xff]   ;;  %v1657_v2 = vld [vmem:[#allocation5 + $0x128] sm:$0xff]   ;;  %v1259_v3 = vld [vmem:[#allocation7 + $0x2] ss:$0 sm:$0xff] }
  0x77   : > { %1396 = vmatpush3.bf16.msra.mxu0 %v1623_v6  ;;  %v1658_v12 = vld [vmem:[#allocation5 + $0x130] sm:$0xff]   ;;  %v1659_v13 = vld [vmem:[#allocation5 + $0x138] sm:$0xff]  }
  0x78   : > { %1397 = vmatprep.subr.bf16.mxu0 %v1849_v0 }
  0x79   : > { %1416 = vmatpush3.bf16.msra.mxu1 %v1631_v14  ;;  %v1660_v14 = vld [vmem:[#allocation5 + $0x140] sm:$0xff]  }
  0x7a   : > { %1417 = vmatprep.subr.bf16.mxu1 %v1849_v0 }
  0x7b   : > { %1398 = vmatpush3.bf16.msra.mxu0 %v1624_v7 }
  0x7c   : > { %1399 = vmatprep.subr.bf16.mxu0 %v1849_v0 }
  0x7d   : > { %1418 = vmatpush3.bf16.msra.mxu1 %v1632_v15  ;;  %v1661_v15 = vld [vmem:[#allocation5 + $0x148] sm:$0xff]  }
  0x7e   : > { %1419 = vmatprep.subr.bf16.mxu1 %v1849_v0 }
  0x7f   : > { %1400 = vmatpush3.bf16.msra.mxu0 %v1625_v8 }
  0x80   : > { %1401 = vmatprep.subr.bf16.mxu0 %v1849_v0 }
  0x81   : > { %1420 = vmatpush3.bf16.msra.mxu1 %v1633_v16  ;;  %v1662_v16 = vld [vmem:[#allocation5 + $0x150] sm:$0xff]  }
  0x82   : > { %1421 = vmatprep.subr.bf16.mxu1 %v1849_v0 }
  0x83   : > { %1402 = vmatpush3.bf16.msra.mxu0 %v1626_v9 }
  0x84   : > { %1403 = vmatprep.subr.bf16.mxu0 %v1849_v0 }
  0x85   : > { %1422 = vmatpush3.bf16.msra.mxu1 %v1634_v24 }
  0x86   : > { %1423 = vmatprep.subr.bf16.mxu1 %v1849_v0 }
  0x87   : > { %1404 = vmatpush3.bf16.msra.mxu0 %v1627_v10 }
  0x88   : > { %1429 = vmatprep.subr.bf16.mxu0 %v1849_v0 }
  0x89   : > { %1424 = vmatpush3.bf16.msra.mxu1 %v1635_v25 }
  0x8a   : > { %1449 = vmatprep.subr.bf16.mxu1 %v1849_v0 }
  0xf9   : > { %v217_v17 = vpop.xlane.xlu0 %216 }
  0xfa   : > { %v219_v18 = vmul.f32 0.0078125, %v217_v17  ;;  %v1663_v17 = vld [vmem:[#allocation5 + $0x158] sm:$0xff]  }
  0xfc   : > { %v220_v19 = vadd.f32 1e-08, %v219_v18  ;;  %v1664_v18 = vld [vmem:[#allocation5 + $0x160] sm:$0xff]  }
  0xfe   : > { %1684 = vrsqrt.f32 %v220_v19  ;;  %v1665_v19 = vld [vmem:[#allocation5 + $0x168] sm:$0xff]  }
 0x108   : > { %v1685_v20 = vpop.eup %1684 }
 0x109   : > { %v222_v21 = vmul.f32 %v1685_v20, %v214_v1  ;;  %v1656_v1 = vld [vmem:[#allocation5 + $0x120] sm:$0xff]  }
 0x10a   : > { %v1268_v20 = vld [vmem:[#allocation7 + $0x3] ss:$0 sm:$0xff] }
 0x10b   : > { %v223_v22 = vmul.f32 0.00125, %v222_v21 }
 0x10d   : > { %v224_v23 = vpack.c.bf16 %v223_v22, %v223_v22 }
 0x10f   : > { %1406 = vmatmul.mubr.bf16.vlgmr.msra.gmra.mrb[0].mxu0 %v224_v23 }
 0x110   : > { %1445 = vmatprep.mubr.msk.bf16.mxu0 %vm1850_vm0, %v1849_v0  ;;  %1430 = vmatpush3.bf16.msra.mxu0 %v1636_v26 }
 0x111   : > { %1431 = vmatprep.subr.bf16.mxu0 %v1849_v0 }
 0x114   : > { %1432 = vmatpush3.bf16.msra.mxu0 %v1637_v27 }
 0x115   : > { %1433 = vmatprep.subr.bf16.mxu0 %v1849_v0 }
 0x118   : > { %1434 = vmatpush3.bf16.msra.mxu0 %v1638_v28 }
 0x119   : > { %1435 = vmatprep.subr.bf16.mxu0 %v1849_v0 }
 0x11c   : > { %1436 = vmatpush3.bf16.msra.mxu0 %v1639_v29  ;;  %v1666_v29 = vld [vmem:[#allocation5 + $0x170] sm:$0xff]  }
 0x11d   : > { %1437 = vmatprep.subr.bf16.mxu0 %v1849_v0 }
 0x120   : > { %1438 = vmatpush3.bf16.msra.mxu0 %v1640_v30  ;;  %v1667_v30 = vld [vmem:[#allocation5 + $0x178] sm:$0xff]  }
 0x121   : > { %1439 = vmatprep.subr.bf16.mxu0 %v1849_v0 }
 0x124   : > { %1440 = vmatpush3.bf16.msra.mxu0 %v1641_v31  ;;  %v1668_v31 = vld [vmem:[#allocation5 + $0x180] sm:$0xff]  }
 0x125   : > { %1441 = vmatprep.subr.bf16.mxu0 %v1849_v0 }
 0x128   : > { %1442 = vmatpush3.bf16.msra.mxu0 %v1642_v41 }
 0x129   : > { %1443 = vmatprep.subr.bf16.mxu0 %v1849_v0 }
 0x12c   : > { %1444 = vmatpush3.bf16.msra.mxu0 %v1643_v42 }
 0x12d   : > { %1469 = vmatprep.subr.bf16.mxu0 %v1849_v0 }
 0x1e2   : > { %v328_v33 = vpop.f32.mrb[0].mxu0 }
 0x1e3   : > { %v329_v34 = vadd.f32 %v1241_v32, %v328_v33  ;;  %v1407_v35 = vpop.f32.mrb[1].mxu0  ;;  %v1669_v32 = vld [vmem:[#allocation5 + $0x188] sm:$0xff]   ;;  %v1670_v33 = vld [vmem:[#allocation5 + $0x190] sm:$0xff]  }
 0x1e4   : > { %v331_v36 = vpop.f32.mrb[2].mxu0  ;;  %v1672_v35 = vld [vmem:[#allocation5 + $0x1a0] sm:$0xff]  }
 0x1e5   : > { %v334_v37 = vmax.f32 %v329_v34, 0.0  ;;  %v1408_v38 = vpop.f32.mrb[3].mxu0  ;;  %v1671_v34 = vld [vmem:[#allocation5 + $0x198] sm:$0xff]   ;;  %v1673_v36 = vld [vmem:[#allocation5 + $0x1a8] sm:$0xff]  }
 0x1e7   : > { %v335_v39 = vmul.f32 0.00125, %v334_v37  ;;  %v1277_v37 = vld [vmem:[#allocation7 + $0x4] ss:$0 sm:$0xff] }
 0x1e9   : > { %v336_v40 = vpack.c.bf16 %v335_v39, %v335_v39 }
 0x1eb   : > { %1426 = vmatmul.mubr.bf16.vlgmr.msra.gmra.mrb[0].mxu1 %v336_v40 }
 0x1ec   : > { %1465 = vmatprep.mubr.msk.bf16.mxu1 %vm1850_vm0, %v1849_v0  ;;  %1450 = vmatpush3.bf16.msra.mxu1 %v1644_v43 }
 0x1ed   : > { %1451 = vmatprep.subr.bf16.mxu1 %v1849_v0 }
 0x1f0   : > { %1452 = vmatpush3.bf16.msra.mxu1 %v1645_v44 }
 0x1f1   : > { %1453 = vmatprep.subr.bf16.mxu1 %v1849_v0 }
 0x1f4   : > { %1454 = vmatpush3.bf16.msra.mxu1 %v1646_v45 }
 0x1f5   : > { %1455 = vmatprep.subr.bf16.mxu1 %v1849_v0 }
 0x1f8   : > { %1456 = vmatpush3.bf16.msra.mxu1 %v1647_v46  ;;  %v1674_v46 = vld [vmem:[#allocation5 + $0x1b0] sm:$0xff]  }
 0x1f9   : > { %1457 = vmatprep.subr.bf16.mxu1 %v1849_v0 }
 0x1fc   : > { %1458 = vmatpush3.bf16.msra.mxu1 %v1648_v47  ;;  %v1675_v47 = vld [vmem:[#allocation5 + $0x1b8] sm:$0xff]  }
 0x1fd   : > { %1459 = vmatprep.subr.bf16.mxu1 %v1849_v0 }
 0x200   : > { %1460 = vmatpush3.bf16.msra.mxu1 %v1649_v48  ;;  %v1676_v48 = vld [vmem:[#allocation5 + $0x1c0] sm:$0xff]  }
 0x201   : > { %1461 = vmatprep.subr.bf16.mxu1 %v1849_v0 }
 0x204   : > { %1462 = vmatpush3.bf16.msra.mxu1 %v1650_v58 }
 0x205   : > { %1463 = vmatprep.subr.bf16.mxu1 %v1849_v0 }
 0x208   : > { %1464 = vmatpush3.bf16.msra.mxu1 %v1651_v59 }
 0x209   : > { %1489 = vmatprep.subr.bf16.mxu1 %v1849_v0 }
 0x2be   : > { %v441_v50 = vpop.f32.mrb[0].mxu1 }
 0x2bf   : > { %v442_v51 = vadd.f32 %v1250_v49, %v441_v50  ;;  %v1427_v52 = vpop.f32.mrb[1].mxu1  ;;  %v1677_v49 = vld [vmem:[#allocation5 + $0x1c8] sm:$0xff]   ;;  %v1678_v50 = vld [vmem:[#allocation5 + $0x1d0] sm:$0xff]  }
 0x2c0   : > { %v444_v53 = vpop.f32.mrb[2].mxu1  ;;  %v1680_v52 = vld [vmem:[#allocation5 + $0x1e0] sm:$0xff]  }
 0x2c1   : > { %v447_v54 = vmax.f32 %v442_v51, 0.0  ;;  %v1428_v55 = vpop.f32.mrb[3].mxu1  ;;  %v1679_v51 = vld [vmem:[#allocation5 + $0x1d8] sm:$0xff]   ;;  %v1681_v53 = vld [vmem:[#allocation5 + $0x1e8] sm:$0xff]  }
 0x2c3   : > { %v448_v56 = vmul.f32 0.00125, %v447_v54  ;;  %v1286_v54 = vld [vmem:[#allocation7 + $0x5] ss:$0 sm:$0xff] }
 0x2c5   : > { %v449_v57 = vpack.c.bf16 %v448_v56, %v448_v56 }
 0x2c7   : > { %1446 = vmatmul.mubr.bf16.vlgmr.msra.gmra.mrb[4].mxu0 %v449_v57 }
 0x2c8   : > { %1485 = vmatprep.mubr.msk.bf16.mxu0 %vm1850_vm0, %v1849_v0  ;;  %1470 = vmatpush3.bf16.msra.mxu0 %v1652_v60 }
 0x2c9   : > { %1471 = vmatprep.subr.bf16.mxu0 %v1849_v0 }
 0x2cc   : > { %1472 = vmatpush3.bf16.msra.mxu0 %v1653_v61 }
 0x2cd   : > { %1473 = vmatprep.subr.bf16.mxu0 %v1849_v0 }
 0x2d0   : > { %1474 = vmatpush3.bf16.msra.mxu0 %v1654_v62 }
 0x2d1   : > { %1475 = vmatprep.subr.bf16.mxu0 %v1849_v0 }
 0x2d4   : > { %1476 = vmatpush3.bf16.msra.mxu0 %v1655_v63  ;;  %v1682_v63 = vld [vmem:[#allocation5 + $0x1f0] sm:$0xff]  }
 0x2d5   : > { %1477 = vmatprep.subr.bf16.mxu0 %v1849_v0 }
 0x2d8   : > { %1478 = vmatpush3.bf16.msra.mxu0 %v1656_v1  ;;  %v1683_v1 = vld [vmem:[#allocation5 + $0x1f8] sm:$0xff]  }
 0x2d9   : > { %1479 = vmatprep.subr.bf16.mxu0 %v1849_v0 }
 0x2dc   : > { %1480 = vmatpush3.bf16.msra.mxu0 %v1657_v2  ;;  %v1295_v2 = vld [vmem:[#allocation7 + $0x6] ss:$0 sm:$0xff] }
 0x2dd   : > { %1481 = vmatprep.subr.bf16.mxu0 %v1849_v0 }
 0x2e0   : > { %1482 = vmatpush3.bf16.msra.mxu0 %v1658_v12 }
 0x2e1   : > { %1483 = vmatprep.subr.bf16.mxu0 %v1849_v0 }
 0x2e4   : > { %1484 = vmatpush3.bf16.msra.mxu0 %v1659_v13 }
 0x2e5   : > { %1509 = vmatprep.subr.bf16.mxu0 %v1849_v0 }
 0x39a   : > { %v554_v4 = vpop.f32.mrb[4].mxu0 }
 0x39b   : > { %v555_v5 = vadd.f32 %v1259_v3, %v554_v4  ;;  %v1447_v6 = vpop.f32.mrb[5].mxu0 }
 0x39c   : > { %v557_v7 = vpop.f32.mrb[6].mxu0 }
 0x39d   : > { %v560_v8 = vmax.f32 %v555_v5, 0.0  ;;  %v1448_v9 = vpop.f32.mrb[7].mxu0 }
 0x39f   : > { %v561_v10 = vmul.f32 0.00125, %v560_v8 }
 0x3a1   : > { %v562_v11 = vpack.c.bf16 %v561_v10, %v561_v10 }
 0x3a3   : > { %1466 = vmatmul.mubr.bf16.vlgmr.msra.gmra.mrb[4].mxu1 %v562_v11  ;;  %v1304_v11 = vld [vmem:[#allocation7 + $0x7] ss:$0 sm:$0xff] }
 0x3a4   : > { %1505 = vmatprep.mubr.msk.bf16.mxu1 %vm1850_vm0, %v1849_v0  ;;  %1490 = vmatpush3.bf16.msra.mxu1 %v1660_v14 }
 0x3a5   : > { %1491 = vmatprep.subr.bf16.mxu1 %v1849_v0 }
 0x3a8   : > { %1492 = vmatpush3.bf16.msra.mxu1 %v1661_v15 }
 0x3a9   : > { %1493 = vmatprep.subr.bf16.mxu1 %v1849_v0 }
 0x3ac   : > { %1494 = vmatpush3.bf16.msra.mxu1 %v1662_v16 }
 0x3ad   : > { %1495 = vmatprep.subr.bf16.mxu1 %v1849_v0 }
 0x3b0   : > { %1496 = vmatpush3.bf16.msra.mxu1 %v1663_v17 }
 0x3b1   : > { %1497 = vmatprep.subr.bf16.mxu1 %v1849_v0 }
 0x3b4   : > { %1498 = vmatpush3.bf16.msra.mxu1 %v1664_v18 }
 0x3b5   : > { %1499 = vmatprep.subr.bf16.mxu1 %v1849_v0 }
 0x3b8   : > { %1500 = vmatpush3.bf16.msra.mxu1 %v1665_v19 }
 0x3b9   : > { %1501 = vmatprep.subr.bf16.mxu1 %v1849_v0 }
 0x3bc   : > { %1502 = vmatpush3.bf16.msra.mxu1 %v1666_v29 }
 0x3bd   : > { %1503 = vmatprep.subr.bf16.mxu1 %v1849_v0 }
 0x3c0   : > { %1504 = vmatpush3.bf16.msra.mxu1 %v1667_v30 }
 0x3c1   : > { %1529 = vmatprep.subr.bf16.mxu1 %v1849_v0 }
 0x476   : > { %v667_v21 = vpop.f32.mrb[4].mxu1 }
 0x477   : > { %v668_v22 = vadd.f32 %v1268_v20, %v667_v21  ;;  %v1467_v23 = vpop.f32.mrb[5].mxu1 }
 0x478   : > { %v670_v24 = vpop.f32.mrb[6].mxu1 }
 0x479   : > { %v673_v25 = vmax.f32 %v668_v22, 0.0  ;;  %v1468_v26 = vpop.f32.mrb[7].mxu1 }
 0x47b   : > { %v674_v27 = vmul.f32 0.00125, %v673_v25 }
 0x47d   : > { %v675_v28 = vpack.c.bf16 %v674_v27, %v674_v27 }
 0x47f   : > { %1486 = vmatmul.mubr.bf16.vlgmr.msra.gmra.mrb[8].mxu0 %v675_v28 }
 0x480   : > { %1525 = vmatprep.mubr.msk.bf16.mxu0 %vm1850_vm0, %v1849_v0  ;;  %1510 = vmatpush3.bf16.msra.mxu0 %v1668_v31 }
 0x481   : > { %1511 = vmatprep.subr.bf16.mxu0 %v1849_v0 }
 0x484   : > { %1512 = vmatpush3.bf16.msra.mxu0 %v1669_v32 }
 0x485   : > { %1513 = vmatprep.subr.bf16.mxu0 %v1849_v0 }
 0x488   : > { %1514 = vmatpush3.bf16.msra.mxu0 %v1670_v33 }
 0x489   : > { %1515 = vmatprep.subr.bf16.mxu0 %v1849_v0 }
 0x48c   : > { %1516 = vmatpush3.bf16.msra.mxu0 %v1671_v34 }
 0x48d   : > { %1517 = vmatprep.subr.bf16.mxu0 %v1849_v0 }
 0x490   : > { %1518 = vmatpush3.bf16.msra.mxu0 %v1672_v35 }
 0x491   : > { %1519 = vmatprep.subr.bf16.mxu0 %v1849_v0 }
 0x494   : > { %1520 = vmatpush3.bf16.msra.mxu0 %v1673_v36 }
 0x495   : > { %1521 = vmatprep.subr.bf16.mxu0 %v1849_v0 }
 0x498   : > { %1522 = vmatpush3.bf16.msra.mxu0 %v1674_v46 }
 0x499   : > { %1523 = vmatprep.subr.bf16.mxu0 %v1849_v0 }
 0x49c   : > { %1524 = vmatpush3.bf16.msra.mxu0 %v1675_v47 }
 0x552   : > { %v780_v38 = vpop.f32.mrb[8].mxu0 }
 0x553   : > { %v781_v39 = vadd.f32 %v1277_v37, %v780_v38  ;;  %v1487_v40 = vpop.f32.mrb[9].mxu0 }
 0x554   : > { %v783_v41 = vpop.f32.mrb[10].mxu0 }
 0x555   : > { %v786_v42 = vmax.f32 %v781_v39, 0.0  ;;  %v1488_v43 = vpop.f32.mrb[11].mxu0 }
 0x557   : > { %v787_v44 = vmul.f32 0.00125, %v786_v42 }
 0x559   : > { %v788_v45 = vpack.c.bf16 %v787_v44, %v787_v44 }
 0x55b   : > { %1506 = vmatmul.mubr.bf16.vlgmr.msra.gmra.mrb[8].mxu1 %v788_v45 }
 0x55c   : > { %1545 = vmatprep.mubr.msk.bf16.mxu1 %vm1850_vm0, %v1849_v0  ;;  %1530 = vmatpush3.bf16.msra.mxu1 %v1676_v48 }
 0x55d   : > { %1531 = vmatprep.subr.bf16.mxu1 %v1849_v0 }
 0x560   : > { %1532 = vmatpush3.bf16.msra.mxu1 %v1677_v49 }
 0x561   : > { %1533 = vmatprep.subr.bf16.mxu1 %v1849_v0 }
 0x564   : > { %1534 = vmatpush3.bf16.msra.mxu1 %v1678_v50 }
 0x565   : > { %1535 = vmatprep.subr.bf16.mxu1 %v1849_v0 }
 0x568   : > { %1536 = vmatpush3.bf16.msra.mxu1 %v1679_v51 }
 0x569   : > { %1537 = vmatprep.subr.bf16.mxu1 %v1849_v0 }
 0x56c   : > { %1538 = vmatpush3.bf16.msra.mxu1 %v1680_v52 }
 0x56d   : > { %1539 = vmatprep.subr.bf16.mxu1 %v1849_v0 }
 0x570   : > { %1540 = vmatpush3.bf16.msra.mxu1 %v1681_v53 }
 0x571   : > { %1541 = vmatprep.subr.bf16.mxu1 %v1849_v0 }
 0x574   : > { %1542 = vmatpush3.bf16.msra.mxu1 %v1682_v63 }
 0x575   : > { %1543 = vmatprep.subr.bf16.mxu1 %v1849_v0 }
 0x578   : > { %1544 = vmatpush3.bf16.msra.mxu1 %v1683_v1 }
 0x62e   : > { %v893_v55 = vpop.f32.mrb[8].mxu1 }
 0x62f   : > { %v894_v56 = vadd.f32 %v1286_v54, %v893_v55  ;;  %v1507_v57 = vpop.f32.mrb[9].mxu1 }
 0x630   : > { %v896_v58 = vpop.f32.mrb[10].mxu1 }
 0x631   : > { %v899_v59 = vmax.f32 %v894_v56, 0.0  ;;  %v1508_v60 = vpop.f32.mrb[11].mxu1 }
 0x633   : > { %v900_v61 = vmul.f32 0.00125, %v899_v59 }
 0x635   : > { %v901_v62 = vpack.c.bf16 %v900_v61, %v900_v61 }
 0x637   : > { %1526 = vmatmul.mubr.bf16.vlgmr.msra.gmra.mrb[12].mxu0 %v901_v62 }
 0x70a   : > { %v1006_v3 = vpop.f32.mrb[12].mxu0 }
 0x70b   : > { %v1007_v4 = vadd.f32 %v1295_v2, %v1006_v3  ;;  %v1527_v5 = vpop.f32.mrb[13].mxu0 }
 0x70c   : > { %v1009_v6 = vpop.f32.mrb[14].mxu0 }
 0x70d   : > { %v1012_v7 = vmax.f32 %v1007_v4, 0.0  ;;  %v1528_v8 = vpop.f32.mrb[15].mxu0 }
 0x70f   : > { %v1013_v9 = vmul.f32 0.00125, %v1012_v7 }
 0x711   : > { %v1014_v10 = vpack.c.bf16 %v1013_v9, %v1013_v9 }
 0x713   : > { %1546 = vmatmul.mubr.bf16.vlgmr.msra.gmra.mrb[12].mxu1 %v1014_v10 }
 0x7e6   : > { %v1119_v0 = vpop.f32.mrb[12].mxu1 }
 0x7e7   : > { %v1120_v12 = vadd.f32 %v1304_v11, %v1119_v0  ;;  %v1547_v13 = vpop.f32.mrb[13].mxu1 }
 0x7e8   : > { %v1122_v14 = vpop.f32.mrb[14].mxu1 }
 0x7e9   : > { %1125 = vst [vmem:[%s212_s20] sm:$0xff] %v1120_v12  ;;  %v1548_v15 = vpop.f32.mrb[15].mxu1 }
 0x7ea   : > { %1785 = shalt.err (!%p1782_p2)
}
 0x7eb   : > { %s1786_s8 = scalar_lea.hbm %s2141_s27, 128  ;;  %s1790_s10 = scalar_lea.hbm %s2188_s3, 256 }
 0x7ec   : > { %p1787_p13 = scmp.ne.s32.totalorder %s2141_s27, %s1786_s8  ;;  %p1791_p4 = scmp.lt.u32.totalorder %s2141_s27, %s2188_s3 }
 0x7ed   : > { %p1792_p5 = scmp.lt.u32.totalorder %s1790_s10, %s1786_s8  ;;  %p1794_p11 = scmp.lt.u32.totalorder %s1786_s8, %s2141_s27 }
 0x7ee   : > { %p1788_p6 = pnand %p1787_p13, %p2202_p0 }
 0x7ef   : > { %p1793_p8 = por %p1792_p5, %p1791_p4 }
 0x7f0   : > { %p1789_p10 = pneg %p1788_p6 }
 0x7f1   : > { %p1795_p1 = por %p1794_p11, %p1793_p8 }
 0x7f3   : > { %p1796_p3 = pnand %p1795_p1, %p1789_p10 }
 0x7f5   : > { %1799 = shalt.err (!%p1796_p3)
}
 0x7f6   : > { %1559 = dma.vmem_to_hbm [thread:$0]  (%p2202_p0), %s2143_s17, 128, %s2141_s27, %s1127_s16  }
 0x7f7 PF: > { %s1152_s28 = sand.u32 1, %s1830_s12   ;;  %p2203_p7 = scmp.ne.s32.totalorder %s2193_s19, 0 }
 0x7f8   : > { %p2204_p9 = scmp.ge.s32.totalorder %s1842_s15, 2  ;;  %s1153_s22 = scalar_lea.sflag [#allocation4], %s1152_s28 }
 0x7fa   : > { %p1573_p12 = pnand %p2204_p9, %p2203_p7 }
 0x7fc   : > { %1825 = dma.done.wait (!%p1573_p12), %s1153_s22, 128  }
 0x7fd   : > { %1827 = vsyncadd (!%p1573_p12), %s1153_s22, 4294967168  ;;  %p17_p2 = scmp.ge.s32.totalorder %s1982_s4, 4   ;;  %s2205_s12 = smov %s1834_s13 }
 0x7fe   : > { %s2206_s13 = smov %s1838_s14  ;;  %s2207_s14 = smov %s1998_s7 }
 0x7ff   : > { %s2208_s15 = smov %s1982_s4  ;;  %19 = sbr.rel (!%p17_p2) target bundleno = 6 (0x6), region = 92 }
 0x806   :  { %1158 = vsyncpa [#allocation3], 1 }
 0x807   :  { %1160 = vsyncpa [#allocation3 + $0x1], 1 }
 0x808   :  { %1161 = vsyncpa [#allocation6], 1 }
 0x809   :  { %1162 = vsyncpa [#allocation4], 1 }
 0x80a   :  { %1164 = vsyncpa [#allocation4 + $0x1], 1 }

// kernel: tpu_custom_call.1
= control target key start
LH: loop header
LB: loop body
LE: loop exit
PB: predicated region body
PF: predicated region fallthrough
CT: control target
= control target key end

     0   :  { %8 = vsyncpa [#allocation3], 0  ;;  %s2185_s0 = inlined_call_operand.hbm [shape: f32[16,128], index: 0, kind: input, shape index: {}]   ;;  %s2186_s1 = inlined_call_operand.hbm [shape: bf16[8,128,128], index: 1, kind: input, shape index: {}]   ;;  %s2187_s2 = inlined_call_operand.hbm [shape: f32[8,128], index: 2, kind: input, shape index: {}]   ;;  %s2188_s3 = inlined_call_operand.hbm [shape: f32[16,128], index: 3, kind: output, shape index: {}]  }
   0x1   :  { %10 = vsyncpa [#allocation3 + $0x1], 0 }
   0x2   :  { %11 = vsyncpa [#allocation6], 0 }
   0x3   :  { %12 = vsyncpa [#allocation4], 0 }
   0x4   :  { %14 = vsyncpa [#allocation4 + $0x1], 0  ;;  %s1872_s12 = smov 0   ;;  %s1874_s13 = smov 0  }
   0x5   :  { %s1876_s14 = smov 0   ;;  %s1878_s15 = smov 0  }
   0x6 LB: > { %s1893_s16 = sadd.s32 4294967295, %s1842_s15   ;;  %s1229_s17 = sadd.s32 4294967294, %s1842_s15   ;;  %s1842_s15 = sphi %s1878_s15, %s2208_s15   ;;  %s1838_s14 = sphi %s1876_s14, %s2207_s14   ;;  %s1834_s13 = sphi %s1874_s13, %s2206_s13   ;;  %s1830_s12 = sphi %s1872_s12, %s2205_s12  }
   0x7   : > { %p40_p0 = scmp.ne.s32.totalorder %s1834_s13, %s1830_s12  ;;  %p2189_p1 = scmp.eq.s32.totalorder %s1893_s16, 0 }
   0x8   : > { %p112_p3 = scmp.eq.s32.totalorder %s1229_s17, 1  ;;  %p1230_p5 = scmp.ge.s32.totalorder %s1842_s15, 1 }
   0x9   : > { %p1902_p4 = por %p2189_p1, %p40_p0  ;;  %p119_p7 = scmp.lt.s32.totalorder %s1842_s15, 3 }
   0xa   : > { %p1907_p6 = por %p112_p3, %p40_p0  ;;  %s1844_s21 = smov [#allocation5]  }
   0xb   : > { %s2192_s18 = scalar_select %p1902_p4, 1, 0 }
   0xc   : > { %s2193_s19 = scalar_select %p1907_p6, 1, 0 }
   0xd   : > { %p1912_p8 = pnand %p1230_p5, %p119_p7  ;;  %s131_s22 = sshll.u32 %s1844_s21, 4  ;;  %s1916_s22 = int_to_ptr.vmem [resolvable:$true] %s131_s22 }
   0xe   : > { %s1845_s24 = smov [#allocation7]   ;;  %s1686_s28 = scalar_lea.hbm %s2186_s1, 8192 }
   0xf   : > { %p1561_p9 = pneg %p1912_p8  ;;  %s145_s25 = sshll.u32 %s1845_s24, 4  ;;  %s1927_s25 = int_to_ptr.vmem [resolvable:$true] %s145_s25 }
  0x10   : > { %p1687_p12 = scmp.ne.s32.totalorder %s2186_s1, %s1686_s28  ;;  %p1693_p5 = scmp.lt.u32.totalorder %s1686_s28, %s2186_s1 }
  0x11   : > { %p1923_p11 = pnand %p1561_p9, %p2189_p1 }
  0x13   : > { %p1688_p13 = pneg %p1923_p11 }
  0x15   : > { %p1689_p0 = pnand %p1688_p13, %p1687_p12 }
  0x17   : > { %p1690_p3 = pneg %p1689_p0 }
  0x19   : > { %p1695_p7 = pnand %p1693_p5, %p1690_p3 }
  0x1b   : > { %1698 = shalt.err (!%p1695_p7)
}
  0x1c   : > { %s1699_s6 = scalar_lea.vmem %s1916_s22, 8192  ;;  %p1707_p2 = scmp.lt.s32.totalorder %s1916_s22, %s1916_s22 }
  0x1d   : > { %p1700_p9 = scmp.ne.s32.totalorder %s1916_s22, %s1699_s6  ;;  %p1708_p12 = scmp.lt.s32.totalorder %s1699_s6, %s1699_s6 }
  0x1f   : > { %p1702_p10 = pnand %p1700_p9, %p1688_p13  ;;  %p1709_p0 = por %p1708_p12, %p1707_p2 }
  0x21   : > { %p1703_p1 = pneg %p1702_p10 }
  0x23   : > { %p1710_p6 = pnand %p1709_p0, %p1703_p1 }
  0x25   : > { %1713 = shalt.err (!%p1710_p6)
}
  0x26   : > { %s1846_s7 = smov 64   ;;  %s1847_s8 = smov 4  }
  0x27   : > { %1564 = dma.hbm_to_vmem [thread:$0]  (!%p1923_p11), %s2186_s1, 8192, %s1916_s22, [#allocation6], %s1846_s7, %s1846_s7, %s1847_s8  }
  0x28   : > { %s1714_s21 = scalar_lea.hbm %s2187_s2, 128 }
  0x29   : > { %p1715_p2 = scmp.ne.s32.totalorder %s2187_s2, %s1714_s21  ;;  %p1721_p10 = scmp.lt.u32.totalorder %s1714_s21, %s2187_s2 }
  0x2b   : > { %p1717_p1 = pnand %p1715_p2, %p1688_p13 }
  0x2d   : > { %p1718_p6 = pneg %p1717_p1 }
  0x2f   : > { %p1723_p3 = pnand %p1721_p10, %p1718_p6 }
  0x31   : > { %1726 = shalt.err (!%p1723_p3)
}
  0x32   : > { %s1727_s22 = scalar_lea.vmem %s1927_s25, 128  ;;  %p1735_p12 = scmp.lt.s32.totalorder %s1927_s25, %s1927_s25 }
  0x33   : > { %p1728_p5 = scmp.ne.s32.totalorder %s1927_s25, %s1727_s22  ;;  %p1736_p0 = scmp.lt.s32.totalorder %s1727_s22, %s1727_s22 }
  0x35   : > { %p1730_p7 = pnand %p1728_p5, %p1688_p13  ;;  %p1737_p2 = por %p1736_p0, %p1735_p12 }
  0x37   : > { %p1731_p9 = pneg %p1730_p7 }
  0x39   : > { %p1738_p1 = pnand %p1737_p2, %p1731_p9 }
  0x3b   : > { %1741 = shalt.err (!%p1738_p1)
}
  0x3c   : > { %1567 = dma.hbm_to_vmem [thread:$0]  (!%p1923_p11), %s2187_s2, 128, %s1927_s25, [#allocation6]  }
  0x3d   : > { %s1982_s4 = sadd.s32 1, %s1842_s15   ;;  %s27_s23 = sadd.s32 1, %s1838_s14 }
  0x3e   : > { %s24_s5 = ssub.s32 %s1842_s15, %s1982_s4  ;;  %p34_p13 = scmp.ne.s32.totalorder %s1838_s14, %s1834_s13 }
  0x3f   : > { %p25_p6 = scmp.eq.s32.totalorder %s24_s5, 0  ;;  %p35_p10 = scmp.eq.s32.totalorder %s1842_s15, 0 }
  0x40   : > { %p2196_p3 = scmp.eq.s32.totalorder %s1893_s16, 1  ;;  %p1578_p7 = scmp.lt.s32.totalorder %s1842_s15, 2 }
  0x41   : > { %s1998_s7 = scalar_select %p25_p6, %s1838_s14, %s27_s23  }
  0x42   : > { %p1992_p5 = por %p2196_p3, %p34_p13  ;;  %p36_p9 = por %p35_p10, %p34_p13 }
  0x43   : > { %s156_s8 = sand.u32 1, %s1838_s14   ;;  %s1235_s25 = sshll.u32 %s1842_s15, 7 }
  0x44   : > { %s2197_s6 = scalar_select %p1992_p5, 1, 0 }
  0x45   : > { %s1234_s9 = sshll.u32 %s156_s8, 3  ;;  %s2005_s17 = scalar_lea.hbm %s2185_s0, %s1235_s25 }
  0x46   : > { %s160_s21 = scalar_lea.vmem [#allocation2], %s1234_s9  ;;  %p2009_p11 = pnand %p1578_p7, %p36_p9 }
  0x47   : > { %s167_s24 = sshll.u32 %s160_s21, 4  ;;  %s157_s27 = scalar_lea.sflag [#allocation3], %s156_s8  ;;  %s2007_s24 = int_to_ptr.vmem [resolvable:$true] %s167_s24 }
  0x48   : > { %s1742_s28 = scalar_lea.hbm %s2005_s17, 128  ;;  %p1744_p0 = pneg %p2009_p11 }
  0x49   : > { %p1743_p12 = scmp.ne.s32.totalorder %s2005_s17, %s1742_s28  ;;  %s1747_s30 = scalar_lea.hbm %s2185_s0, 256 }
  0x4a   : > { %p1748_p13 = scmp.lt.u32.totalorder %s2005_s17, %s2185_s0  ;;  %p1749_p6 = scmp.lt.u32.totalorder %s1747_s30, %s1742_s28 }
  0x4b   : > { %p1745_p2 = pnand %p1744_p0, %p1743_p12  ;;  %p1751_p3 = scmp.lt.u32.totalorder %s1742_s28, %s2005_s17 }
  0x4c   : > { %p1750_p10 = por %p1749_p6, %p1748_p13 }
  0x4d   : > { %p1746_p1 = pneg %p1745_p2 }
  0x4e   : > { %p1752_p7 = por %p1751_p3, %p1750_p10 }
  0x50   : > { %p1753_p9 = pnand %p1752_p7, %p1746_p1 }
  0x52   : > { %1756 = shalt.err (!%p1753_p9)
}
  0x53   : > { %s1757_s8 = scalar_lea.vmem %s2007_s24, 128  ;;  %s1848_s9 = smov [#allocation2]  }
  0x54   : > { %p1758_p12 = scmp.ne.s32.totalorder %s2007_s24, %s1757_s8  ;;  %s1762_s25 = sshll.u32 %s1848_s9, 4  ;;  %s1763_s25 = int_to_ptr.vmem [resolvable:$false] %s1762_s25 }
  0x55   : > { %s1764_s10 = scalar_lea.vmem %s1763_s25, 256  ;;  %p1765_p4 = scmp.lt.s32.totalorder %s2007_s24, %s1763_s25 }
  0x56   : > { %p1760_p2 = pnand %p1758_p12, %p1744_p0  ;;  %p1766_p13 = scmp.lt.s32.totalorder %s1764_s10, %s1757_s8 }
  0x58   : > { %p1761_p5 = pneg %p1760_p2  ;;  %p1767_p6 = por %p1766_p13, %p1765_p4 }
  0x5a   : > { %p1768_p10 = pnand %p1767_p6, %p1761_p5 }
  0x5c   : > { %1771 = shalt.err (!%p1768_p10)
}
  0x5d   : > { %1571 = dma.hbm_to_vmem [thread:$0]  (!%p2009_p11), %s2005_s17, 128, %s2007_s24, %s157_s27  }
  0x5e   : > { %176 = sbr.rel (%p1912_p8) target bundleno = 2039 (0x7f7), region = 32  ;;  %s2041_s11 = sand.u32 (!%p1912_p8), 1, %s1834_s13  }
  0x5f   : > { %s1237_s21 = sshll.u32 (!%p1912_p8), %s2041_s11, 3  ;;  %s179_s28 = scalar_lea.sflag (!%p1912_p8), [#allocation3], %s2041_s11 }
  0x60   : > { %s182_s22 = scalar_lea.vmem (!%p1912_p8), [#allocation2], %s1237_s21  ;;  %p2199_p4 = scmp.ne.s32.totalorder (!%p1912_p8), %s2192_s18, 0 }
  0x65   : > { %1817 = dma.done.wait (%p2199_p4), %s179_s28, 128  }
  0x66   : > { %1819 = vsyncadd (%p2199_p4), %s179_s28, 4294967168  ;;  %p2200_p5 = scmp.eq.s32.totalorder %s1893_s16, 0 }
  0x68   : > { %1821 = dma.done.wait (%p2200_p5), [#allocation6], 8320   ;;  %p2201_p8 = pmov %p2200_p5 }
  0x69   : > { %v1849_v0 = vmov 0.0   ;;  %v214_v1 = vld [vmem:[%s182_s22] sm:$0xff]  ;;  %v1620_v3 = vld [vmem:[#allocation5] sm:$0xff]   ;;  %v1621_v4 = vld [vmem:[#allocation5 + $0x8] sm:$0xff]   ;;  %vm1850_vm0 = vmmov 0   ;;  %s1314_s18 = sshll.u32 %s1893_s16, 7 }
  0x6a   : > { %1823 = vsyncadd (%p2201_p8), [#allocation6], 4294958976  ;;  %1389 = vmatprep.subr.bf16.mxu0 %v1849_v0  ;;  %1409 = vmatprep.subr.bf16.mxu1 %v1849_v0  ;;  %v215_v2 = vmul.f32 %v214_v1, %v214_v1  ;;  %v1622_v5 = vld [vmem:[#allocation5 + $0x10] sm:$0xff]   ;;  %v1623_v6 = vld [vmem:[#allocation5 + $0x18] sm:$0xff]   ;;  %s212_s20 = scalar_lea.vmem [#allocation8], %s1237_s21  ;;  %s2141_s27 = scalar_lea.hbm %s2188_s3, %s1314_s18 }
  0x6b   : > { %1390 = vmatpush3.bf16.msra.mxu0 %v1620_v3  ;;  %v1624_v7 = vld [vmem:[#allocation5 + $0x20] sm:$0xff]   ;;  %v1625_v8 = vld [vmem:[#allocation5 + $0x28] sm:$0xff]   ;;  %1405 = vmatprep.mubr.msk.bf16.mxu0 %vm1850_vm0, %v1849_v0  ;;  %v1626_v9 = vld [vmem:[#allocation5 + $0x30] sm:$0xff]   ;;  %s1140_s17 = sshll.u32 %s212_s20, 4  ;;  %s1127_s16 = scalar_lea.sflag [#allocation4], %s2041_s11  ;;  %s2143_s17 = int_to_ptr.vmem [resolvable:$true] %s1140_s17 }
  0x6c   : > { %216 = vadd.xlane.f32.xlu0 %v215_v2  ;;  %1391 = vmatprep.subr.bf16.mxu0 %v1849_v0  ;;  %v1627_v10 = vld [vmem:[#allocation5 + $0x38] sm:$0xff]   ;;  %v1628_v11 = vld [vmem:[#allocation5 + $0x40] sm:$0xff]   ;;  %v1629_v12 = vld [vmem:[#allocation5 + $0x48] sm:$0xff]   ;;  %s1772_s29 = scalar_lea.vmem %s2143_s17, 128  ;;  %p2202_p0 = scmp.ne.s32.totalorder %s2197_s6, 0 }
  0x6d   : > { %1425 = vmatprep.mubr.msk.bf16.mxu1 %vm1850_vm0, %v1849_v0  ;;  %1410 = vmatpush3.bf16.msra.mxu1 %v1628_v11  ;;  %v1630_v13 = vld [vmem:[#allocation5 + $0x50] sm:$0xff]   ;;  %v1631_v14 = vld [vmem:[#allocation5 + $0x58] sm:$0xff]   ;;  %v1632_v15 = vld [vmem:[#allocation5 + $0x60] sm:$0xff]   ;;  %p1773_p11 = scmp.ne.s32.totalorder %s2143_s17, %s1772_s29  ;;  %s1851_s30 = smov [#allocation8]  }
  0x6e   : > { %1411 = vmatprep.subr.bf16.mxu1 %v1849_v0  ;;  %v1633_v16 = vld [vmem:[#allocation5 + $0x68] sm:$0xff]   ;;  %v1634_v24 = vld [vmem:[#allocation5 + $0x70] sm:$0xff]   ;;  %v1635_v25 = vld [vmem:[#allocation5 + $0x78] sm:$0xff]   ;;  %s1776_s23 = sshll.u32 %s1851_s30, 4  ;;  %s1777_s23 = int_to_ptr.vmem [resolvable:$false] %s1776_s23 }
  0x6f   : > { %1392 = vmatpush3.bf16.msra.mxu0 %v1621_v4  ;;  %v1636_v26 = vld [vmem:[#allocation5 + $0x80] sm:$0xff]   ;;  %v1637_v27 = vld [vmem:[#allocation5 + $0x88] sm:$0xff]   ;;  %v1638_v28 = vld [vmem:[#allocation5 + $0x90] sm:$0xff]   ;;  %p1774_p1 = pnand %p1773_p11, %p2202_p0  ;;  %s1778_s5 = scalar_lea.vmem %s1777_s23, 256 }
  0x70   : > { %1393 = vmatprep.subr.bf16.mxu0 %v1849_v0  ;;  %v1639_v29 = vld [vmem:[#allocation5 + $0x98] sm:$0xff]   ;;  %v1640_v30 = vld [vmem:[#allocation5 + $0xa0] sm:$0xff]   ;;  %v1641_v31 = vld [vmem:[#allocation5 + $0xa8] sm:$0xff]   ;;  %p1779_p7 = scmp.lt.s32.totalorder %s2143_s17, %s1777_s23  ;;  %p1780_p9 = scmp.lt.s32.totalorder %s1778_s5, %s1772_s29 }
  0x71   : > { %1412 = vmatpush3.bf16.msra.mxu1 %v1629_v12  ;;  %v1241_v32 = vld [vmem:[#allocation7] ss:$0 sm:$0xff]  ;;  %v1642_v41 = vld [vmem:[#allocation5 + $0xb0] sm:$0xff]   ;;  %v1643_v42 = vld [vmem:[#allocation5 + $0xb8] sm:$0xff]   ;;  %p1775_p3 = pneg %p1774_p1 }
  0x72   : > { %1413 = vmatprep.subr.bf16.mxu1 %v1849_v0  ;;  %v1644_v43 = vld [vmem:[#allocation5 + $0xc0] sm:$0xff]   ;;  %v1645_v44 = vld [vmem:[#allocation5 + $0xc8] sm:$0xff]   ;;  %v1646_v45 = vld [vmem:[#allocation5 + $0xd0] sm:$0xff]   ;;  %p1781_p12 = por %p1780_p9, %p1779_p7 }
  0x73   : > { %1394 = vmatpush3.bf16.msra.mxu0 %v1622_v5  ;;  %v1647_v46 = vld [vmem:[#allocation5 + $0xd8] sm:$0xff]   ;;  %v1648_v47 = vld [vmem:[#allocation5 + $0xe0] sm:$0xff]   ;;  %v1649_v48 = vld [vmem:[#allocation5 + $0xe8] sm:$0xff]  }
  0x74   : > { %1395 = vmatprep.subr.bf16.mxu0 %v1849_v0  ;;  %v1250_v49 = vld [vmem:[#allocation7 + $0x1] ss:$0 sm:$0xff]  ;;  %v1650_v58 = vld [vmem:[#allocation5 + $0xf0] sm:$0xff]   ;;  %v1651_v59 = vld [vmem:[#allocation5 + $0xf8] sm:$0xff]   ;;  %p1782_p2 = pnand %p1781_p12, %p1775_p3 }
  0x75   : > { %1414 = vmatpush3.bf16.msra.mxu1 %v1630_v13  ;;  %v1652_v60 = vld [vmem:[#allocation5 + $0x100] sm:$0xff]   ;;  %v1653_v61 = vld [vmem:[#allocation5 + $0x108] sm:$0xff]   ;;  %v1654_v62 = vld [vmem:[#allocation5 + $0x110] sm:$0xff]  }
  0x76   : > { %1415 = vmatprep.subr.bf16.mxu1 %v1849_v0  ;;  %v1655_v63 = vld [vmem:[#allocation5 + $0x118] sm:$0xff]   ;;  %v1657_v2 = vld [vmem:[#allocation5 + $0x128] sm:$0xff]   ;;  %v1259_v3 = vld [vmem:[#allocation7 + $0x2] ss:$0 sm:$0xff] }
  0x77   : > { %1396 = vmatpush3.bf16.msra.mxu0 %v1623_v6  ;;  %v1658_v12 = vld [vmem:[#allocation5 + $0x130] sm:$0xff]   ;;  %v1659_v13 = vld [vmem:[#allocation5 + $0x138] sm:$0xff]  }
  0x78   : > { %1397 = vmatprep.subr.bf16.mxu0 %v1849_v0 }
  0x79   : > { %1416 = vmatpush3.bf16.msra.mxu1 %v1631_v14  ;;  %v1660_v14 = vld [vmem:[#allocation5 + $0x140] sm:$0xff]  }
  0x7a   : > { %1417 = vmatprep.subr.bf16.mxu1 %v1849_v0 }
  0x7b   : > { %1398 = vmatpush3.bf16.msra.mxu0 %v1624_v7 }
  0x7c   : > { %1399 = vmatprep.subr.bf16.mxu0 %v1849_v0 }
  0x7d   : > { %1418 = vmatpush3.bf16.msra.mxu1 %v1632_v15  ;;  %v1661_v15 = vld [vmem:[#allocation5 + $0x148] sm:$0xff]  }
  0x7e   : > { %1419 = vmatprep.subr.bf16.mxu1 %v1849_v0 }
  0x7f   : > { %1400 = vmatpush3.bf16.msra.mxu0 %v1625_v8 }
  0x80   : > { %1401 = vmatprep.subr.bf16.mxu0 %v1849_v0 }
  0x81   : > { %1420 = vmatpush3.bf16.msra.mxu1 %v1633_v16  ;;  %v1662_v16 = vld [vmem:[#allocation5 + $0x150] sm:$0xff]  }
  0x82   : > { %1421 = vmatprep.subr.bf16.mxu1 %v1849_v0 }
  0x83   : > { %1402 = vmatpush3.bf16.msra.mxu0 %v1626_v9 }
  0x84   : > { %1403 = vmatprep.subr.bf16.mxu0 %v1849_v0 }
  0x85   : > { %1422 = vmatpush3.bf16.msra.mxu1 %v1634_v24 }
  0x86   : > { %1423 = vmatprep.subr.bf16.mxu1 %v1849_v0 }
  0x87   : > { %1404 = vmatpush3.bf16.msra.mxu0 %v1627_v10 }
  0x88   : > { %1429 = vmatprep.subr.bf16.mxu0 %v1849_v0 }
  0x89   : > { %1424 = vmatpush3.bf16.msra.mxu1 %v1635_v25 }
  0x8a   : > { %1449 = vmatprep.subr.bf16.mxu1 %v1849_v0 }
  0xf9   : > { %v217_v17 = vpop.xlane.xlu0 %216 }
  0xfa   : > { %v219_v18 = vmul.f32 0.0078125, %v217_v17  ;;  %v1663_v17 = vld [vmem:[#allocation5 + $0x158] sm:$0xff]  }
  0xfc   : > { %v220_v19 = vadd.f32 1e-08, %v219_v18  ;;  %v1664_v18 = vld [vmem:[#allocation5 + $0x160] sm:$0xff]  }
  0xfe   : > { %1684 = vrsqrt.f32 %v220_v19  ;;  %v1665_v19 = vld [vmem:[#allocation5 + $0x168] sm:$0xff]  }
 0x108   : > { %v1685_v20 = vpop.eup %1684 }
 0x109   : > { %v222_v21 = vmul.f32 %v1685_v20, %v214_v1  ;;  %v1656_v1 = vld [vmem:[#allocation5 + $0x120] sm:$0xff]  }
 0x10a   : > { %v1268_v20 = vld [vmem:[#allocation7 + $0x3] ss:$0 sm:$0xff] }
 0x10b   : > { %v223_v22 = vmul.f32 0.00125, %v222_v21 }
 0x10d   : > { %v224_v23 = vpack.c.bf16 %v223_v22, %v223_v22 }
 0x10f   : > { %1406 = vmatmul.mubr.bf16.vlgmr.msra.gmra.mrb[0].mxu0 %v224_v23 }
 0x110   : > { %1445 = vmatprep.mubr.msk.bf16.mxu0 %vm1850_vm0, %v1849_v0  ;;  %1430 = vmatpush3.bf16.msra.mxu0 %v1636_v26 }
 0x111   : > { %1431 = vmatprep.subr.bf16.mxu0 %v1849_v0 }
 0x114   : > { %1432 = vmatpush3.bf16.msra.mxu0 %v1637_v27 }
 0x115   : > { %1433 = vmatprep.subr.bf16.mxu0 %v1849_v0 }
 0x118   : > { %1434 = vmatpush3.bf16.msra.mxu0 %v1638_v28 }
 0x119   : > { %1435 = vmatprep.subr.bf16.mxu0 %v1849_v0 }
 0x11c   : > { %1436 = vmatpush3.bf16.msra.mxu0 %v1639_v29  ;;  %v1666_v29 = vld [vmem:[#allocation5 + $0x170] sm:$0xff]  }
 0x11d   : > { %1437 = vmatprep.subr.bf16.mxu0 %v1849_v0 }
 0x120   : > { %1438 = vmatpush3.bf16.msra.mxu0 %v1640_v30  ;;  %v1667_v30 = vld [vmem:[#allocation5 + $0x178] sm:$0xff]  }
 0x121   : > { %1439 = vmatprep.subr.bf16.mxu0 %v1849_v0 }
 0x124   : > { %1440 = vmatpush3.bf16.msra.mxu0 %v1641_v31  ;;  %v1668_v31 = vld [vmem:[#allocation5 + $0x180] sm:$0xff]  }
 0x125   : > { %1441 = vmatprep.subr.bf16.mxu0 %v1849_v0 }
 0x128   : > { %1442 = vmatpush3.bf16.msra.mxu0 %v1642_v41 }
 0x129   : > { %1443 = vmatprep.subr.bf16.mxu0 %v1849_v0 }
 0x12c   : > { %1444 = vmatpush3.bf16.msra.mxu0 %v1643_v42 }
 0x12d   : > { %1469 = vmatprep.subr.bf16.mxu0 %v1849_v0 }
 0x1e2   : > { %v328_v33 = vpop.f32.mrb[0].mxu0 }
 0x1e3   : > { %v329_v34 = vadd.f32 %v1241_v32, %v328_v33  ;;  %v1407_v35 = vpop.f32.mrb[1].mxu0  ;;  %v1669_v32 = vld [vmem:[#allocation5 + $0x188] sm:$0xff]   ;;  %v1670_v33 = vld [vmem:[#allocation5 + $0x190] sm:$0xff]  }
 0x1e4   : > { %v331_v36 = vpop.f32.mrb[2].mxu0  ;;  %v1672_v35 = vld [vmem:[#allocation5 + $0x1a0] sm:$0xff]  }
 0x1e5   : > { %v334_v37 = vmax.f32 %v329_v34, 0.0  ;;  %v1408_v38 = vpop.f32.mrb[3].mxu0  ;;  %v1671_v34 = vld [vmem:[#allocation5 + $0x198] sm:$0xff]   ;;  %v1673_v36 = vld [vmem:[#allocation5 + $0x1a8] sm:$0xff]  }
 0x1e7   : > { %v335_v39 = vmul.f32 0.00125, %v334_v37  ;;  %v1277_v37 = vld [vmem:[#allocation7 + $0x4] ss:$0 sm:$0xff] }
 0x1e9   : > { %v336_v40 = vpack.c.bf16 %v335_v39, %v335_v39 }
 0x1eb   : > { %1426 = vmatmul.mubr.bf16.vlgmr.msra.gmra.mrb[0].mxu1 %v336_v40 }
 0x1ec   : > { %1465 = vmatprep.mubr.msk.bf16.mxu1 %vm1850_vm0, %v1849_v0  ;;  %1450 = vmatpush3.bf16.msra.mxu1 %v1644_v43 }
 0x1ed   : > { %1451 = vmatprep.subr.bf16.mxu1 %v1849_v0 }
 0x1f0   : > { %1452 = vmatpush3.bf16.msra.mxu1 %v1645_v44 }
 0x1f1   : > { %1453 = vmatprep.subr.bf16.mxu1 %v1849_v0 }
 0x1f4   : > { %1454 = vmatpush3.bf16.msra.mxu1 %v1646_v45 }
 0x1f5   : > { %1455 = vmatprep.subr.bf16.mxu1 %v1849_v0 }
 0x1f8   : > { %1456 = vmatpush3.bf16.msra.mxu1 %v1647_v46  ;;  %v1674_v46 = vld [vmem:[#allocation5 + $0x1b0] sm:$0xff]  }
 0x1f9   : > { %1457 = vmatprep.subr.bf16.mxu1 %v1849_v0 }
 0x1fc   : > { %1458 = vmatpush3.bf16.msra.mxu1 %v1648_v47  ;;  %v1675_v47 = vld [vmem:[#allocation5 + $0x1b8] sm:$0xff]  }
 0x1fd   : > { %1459 = vmatprep.subr.bf16.mxu1 %v1849_v0 }
 0x200   : > { %1460 = vmatpush3.bf16.msra.mxu1 %v1649_v48  ;;  %v1676_v48 = vld [vmem:[#allocation5 + $0x1c0] sm:$0xff]  }
 0x201   : > { %1461 = vmatprep.subr.bf16.mxu1 %v1849_v0 }
 0x204   : > { %1462 = vmatpush3.bf16.msra.mxu1 %v1650_v58 }
 0x205   : > { %1463 = vmatprep.subr.bf16.mxu1 %v1849_v0 }
 0x208   : > { %1464 = vmatpush3.bf16.msra.mxu1 %v1651_v59 }
 0x209   : > { %1489 = vmatprep.subr.bf16.mxu1 %v1849_v0 }
 0x2be   : > { %v441_v50 = vpop.f32.mrb[0].mxu1 }
 0x2bf   : > { %v442_v51 = vadd.f32 %v1250_v49, %v441_v50  ;;  %v1427_v52 = vpop.f32.mrb[1].mxu1  ;;  %v1677_v49 = vld [vmem:[#allocation5 + $0x1c8] sm:$0xff]   ;;  %v1678_v50 = vld [vmem:[#allocation5 + $0x1d0] sm:$0xff]  }
 0x2c0   : > { %v444_v53 = vpop.f32.mrb[2].mxu1  ;;  %v1680_v52 = vld [vmem:[#allocation5 + $0x1e0] sm:$0xff]  }
 0x2c1   : > { %v447_v54 = vmax.f32 %v442_v51, 0.0  ;;  %v1428_v55 = vpop.f32.mrb[3].mxu1  ;;  %v1679_v51 = vld [vmem:[#allocation5 + $0x1d8] sm:$0xff]   ;;  %v1681_v53 = vld [vmem:[#allocation5 + $0x1e8] sm:$0xff]  }
 0x2c3   : > { %v448_v56 = vmul.f32 0.00125, %v447_v54  ;;  %v1286_v54 = vld [vmem:[#allocation7 + $0x5] ss:$0 sm:$0xff] }
 0x2c5   : > { %v449_v57 = vpack.c.bf16 %v448_v56, %v448_v56 }
 0x2c7   : > { %1446 = vmatmul.mubr.bf16.vlgmr.msra.gmra.mrb[4].mxu0 %v449_v57 }
 0x2c8   : > { %1485 = vmatprep.mubr.msk.bf16.mxu0 %vm1850_vm0, %v1849_v0  ;;  %1470 = vmatpush3.bf16.msra.mxu0 %v1652_v60 }
 0x2c9   : > { %1471 = vmatprep.subr.bf16.mxu0 %v1849_v0 }
 0x2cc   : > { %1472 = vmatpush3.bf16.msra.mxu0 %v1653_v61 }
 0x2cd   : > { %1473 = vmatprep.subr.bf16.mxu0 %v1849_v0 }
 0x2d0   : > { %1474 = vmatpush3.bf16.msra.mxu0 %v1654_v62 }
 0x2d1   : > { %1475 = vmatprep.subr.bf16.mxu0 %v1849_v0 }
 0x2d4   : > { %1476 = vmatpush3.bf16.msra.mxu0 %v1655_v63  ;;  %v1682_v63 = vld [vmem:[#allocation5 + $0x1f0] sm:$0xff]  }
 0x2d5   : > { %1477 = vmatprep.subr.bf16.mxu0 %v1849_v0 }
 0x2d8   : > { %1478 = vmatpush3.bf16.msra.mxu0 %v1656_v1  ;;  %v1683_v1 = vld [vmem:[#allocation5 + $0x1f8] sm:$0xff]  }
 0x2d9   : > { %1479 = vmatprep.subr.bf16.mxu0 %v1849_v0 }
 0x2dc   : > { %1480 = vmatpush3.bf16.msra.mxu0 %v1657_v2  ;;  %v1295_v2 = vld [vmem:[#allocation7 + $0x6] ss:$0 sm:$0xff] }
 0x2dd   : > { %1481 = vmatprep.subr.bf16.mxu0 %v1849_v0 }
 0x2e0   : > { %1482 = vmatpush3.bf16.msra.mxu0 %v1658_v12 }
 0x2e1   : > { %1483 = vmatprep.subr.bf16.mxu0 %v1849_v0 }
 0x2e4   : > { %1484 = vmatpush3.bf16.msra.mxu0 %v1659_v13 }
 0x2e5   : > { %1509 = vmatprep.subr.bf16.mxu0 %v1849_v0 }
 0x39a   : > { %v554_v4 = vpop.f32.mrb[4].mxu0 }
 0x39b   : > { %v555_v5 = vadd.f32 %v1259_v3, %v554_v4  ;;  %v1447_v6 = vpop.f32.mrb[5].mxu0 }
 0x39c   : > { %v557_v7 = vpop.f32.mrb[6].mxu0 }
 0x39d   : > { %v560_v8 = vmax.f32 %v555_v5, 0.0  ;;  %v1448_v9 = vpop.f32.mrb[7].mxu0 }
 0x39f   : > { %v561_v10 = vmul.f32 0.00125, %v560_v8 }
 0x3a1   : > { %v562_v11 = vpack.c.bf16 %v561_v10, %v561_v10 }
 0x3a3   : > { %1466 = vmatmul.mubr.bf16.vlgmr.msra.gmra.mrb[4].mxu1 %v562_v11  ;;  %v1304_v11 = vld [vmem:[#allocation7 + $0x7] ss:$0 sm:$0xff] }
 0x3a4   : > { %1505 = vmatprep.mubr.msk.bf16.mxu1 %vm1850_vm0, %v1849_v0  ;;  %1490 = vmatpush3.bf16.msra.mxu1 %v1660_v14 }
 0x3a5   : > { %1491 = vmatprep.subr.bf16.mxu1 %v1849_v0 }
 0x3a8   : > { %1492 = vmatpush3.bf16.msra.mxu1 %v1661_v15 }
 0x3a9   : > { %1493 = vmatprep.subr.bf16.mxu1 %v1849_v0 }
 0x3ac   : > { %1494 = vmatpush3.bf16.msra.mxu1 %v1662_v16 }
 0x3ad   : > { %1495 = vmatprep.subr.bf16.mxu1 %v1849_v0 }
 0x3b0   : > { %1496 = vmatpush3.bf16.msra.mxu1 %v1663_v17 }
 0x3b1   : > { %1497 = vmatprep.subr.bf16.mxu1 %v1849_v0 }
 0x3b4   : > { %1498 = vmatpush3.bf16.msra.mxu1 %v1664_v18 }
 0x3b5   : > { %1499 = vmatprep.subr.bf16.mxu1 %v1849_v0 }
 0x3b8   : > { %1500 = vmatpush3.bf16.msra.mxu1 %v1665_v19 }
 0x3b9   : > { %1501 = vmatprep.subr.bf16.mxu1 %v1849_v0 }
 0x3bc   : > { %1502 = vmatpush3.bf16.msra.mxu1 %v1666_v29 }
 0x3bd   : > { %1503 = vmatprep.subr.bf16.mxu1 %v1849_v0 }
 0x3c0   : > { %1504 = vmatpush3.bf16.msra.mxu1 %v1667_v30 }
 0x3c1   : > { %1529 = vmatprep.subr.bf16.mxu1 %v1849_v0 }
 0x476   : > { %v667_v21 = vpop.f32.mrb[4].mxu1 }
 0x477   : > { %v668_v22 = vadd.f32 %v1268_v20, %v667_v21  ;;  %v1467_v23 = vpop.f32.mrb[5].mxu1 }
 0x478   : > { %v670_v24 = vpop.f32.mrb[6].mxu1 }
 0x479   : > { %v673_v25 = vmax.f32 %v668_v22, 0.0  ;;  %v1468_v26 = vpop.f32.mrb[7].mxu1 }
 0x47b   : > { %v674_v27 = vmul.f32 0.00125, %v673_v25 }
 0x47d   : > { %v675_v28 = vpack.c.bf16 %v674_v27, %v674_v27 }
 0x47f   : > { %1486 = vmatmul.mubr.bf16.vlgmr.msra.gmra.mrb[8].mxu0 %v675_v28 }
 0x480   : > { %1525 = vmatprep.mubr.msk.bf16.mxu0 %vm1850_vm0, %v1849_v0  ;;  %1510 = vmatpush3.bf16.msra.mxu0 %v1668_v31 }
 0x481   : > { %1511 = vmatprep.subr.bf16.mxu0 %v1849_v0 }
 0x484   : > { %1512 = vmatpush3.bf16.msra.mxu0 %v1669_v32 }
 0x485   : > { %1513 = vmatprep.subr.bf16.mxu0 %v1849_v0 }
 0x488   : > { %1514 = vmatpush3.bf16.msra.mxu0 %v1670_v33 }
 0x489   : > { %1515 = vmatprep.subr.bf16.mxu0 %v1849_v0 }
 0x48c   : > { %1516 = vmatpush3.bf16.msra.mxu0 %v1671_v34 }
 0x48d   : > { %1517 = vmatprep.subr.bf16.mxu0 %v1849_v0 }
 0x490   : > { %1518 = vmatpush3.bf16.msra.mxu0 %v1672_v35 }
 0x491   : > { %1519 = vmatprep.subr.bf16.mxu0 %v1849_v0 }
 0x494   : > { %1520 = vmatpush3.bf16.msra.mxu0 %v1673_v36 }
 0x495   : > { %1521 = vmatprep.subr.bf16.mxu0 %v1849_v0 }
 0x498   : > { %1522 = vmatpush3.bf16.msra.mxu0 %v1674_v46 }
 0x499   : > { %1523 = vmatprep.subr.bf16.mxu0 %v1849_v0 }
 0x49c   : > { %1524 = vmatpush3.bf16.msra.mxu0 %v1675_v47 }
 0x552   : > { %v780_v38 = vpop.f32.mrb[8].mxu0 }
 0x553   : > { %v781_v39 = vadd.f32 %v1277_v37, %v780_v38  ;;  %v1487_v40 = vpop.f32.mrb[9].mxu0 }
 0x554   : > { %v783_v41 = vpop.f32.mrb[10].mxu0 }
 0x555   : > { %v786_v42 = vmax.f32 %v781_v39, 0.0  ;;  %v1488_v43 = vpop.f32.mrb[11].mxu0 }
 0x557   : > { %v787_v44 = vmul.f32 0.00125, %v786_v42 }
 0x559   : > { %v788_v45 = vpack.c.bf16 %v787_v44, %v787_v44 }
 0x55b   : > { %1506 = vmatmul.mubr.bf16.vlgmr.msra.gmra.mrb[8].mxu1 %v788_v45 }
 0x55c   : > { %1545 = vmatprep.mubr.msk.bf16.mxu1 %vm1850_vm0, %v1849_v0  ;;  %1530 = vmatpush3.bf16.msra.mxu1 %v1676_v48 }
 0x55d   : > { %1531 = vmatprep.subr.bf16.mxu1 %v1849_v0 }
 0x560   : > { %1532 = vmatpush3.bf16.msra.mxu1 %v1677_v49 }
 0x561   : > { %1533 = vmatprep.subr.bf16.mxu1 %v1849_v0 }
 0x564   : > { %1534 = vmatpush3.bf16.msra.mxu1 %v1678_v50 }
 0x565   : > { %1535 = vmatprep.subr.bf16.mxu1 %v1849_v0 }
 0x568   : > { %1536 = vmatpush3.bf16.msra.mxu1 %v1679_v51 }
 0x569   : > { %1537 = vmatprep.subr.bf16.mxu1 %v1849_v0 }
 0x56c   : > { %1538 = vmatpush3.bf16.msra.mxu1 %v1680_v52 }
 0x56d   : > { %1539 = vmatprep.subr.bf16.mxu1 %v1849_v0 }
 0x570   : > { %1540 = vmatpush3.bf16.msra.mxu1 %v1681_v53 }
 0x571   : > { %1541 = vmatprep.subr.bf16.mxu1 %v1849_v0 }
 0x574   : > { %1542 = vmatpush3.bf16.msra.mxu1 %v1682_v63 }
 0x575   : > { %1543 = vmatprep.subr.bf16.mxu1 %v1849_v0 }
 0x578   : > { %1544 = vmatpush3.bf16.msra.mxu1 %v1683_v1 }
 0x62e   : > { %v893_v55 = vpop.f32.mrb[8].mxu1 }
 0x62f   : > { %v894_v56 = vadd.f32 %v1286_v54, %v893_v55  ;;  %v1507_v57 = vpop.f32.mrb[9].mxu1 }
 0x630   : > { %v896_v58 = vpop.f32.mrb[10].mxu1 }
 0x631   : > { %v899_v59 = vmax.f32 %v894_v56, 0.0  ;;  %v1508_v60 = vpop.f32.mrb[11].mxu1 }
 0x633   : > { %v900_v61 = vmul.f32 0.00125, %v899_v59 }
 0x635   : > { %v901_v62 = vpack.c.bf16 %v900_v61, %v900_v61 }
 0x637   : > { %1526 = vmatmul.mubr.bf16.vlgmr.msra.gmra.mrb[12].mxu0 %v901_v62 }
 0x70a   : > { %v1006_v3 = vpop.f32.mrb[12].mxu0 }
 0x70b   : > { %v1007_v4 = vadd.f32 %v1295_v2, %v1006_v3  ;;  %v1527_v5 = vpop.f32.mrb[13].mxu0 }
 0x70c   : > { %v1009_v6 = vpop.f32.mrb[14].mxu0 }
 0x70d   : > { %v1012_v7 = vmax.f32 %v1007_v4, 0.0  ;;  %v1528_v8 = vpop.f32.mrb[15].mxu0 }
 0x70f   : > { %v1013_v9 = vmul.f32 0.00125, %v1012_v7 }
 0x711   : > { %v1014_v10 = vpack.c.bf16 %v1013_v9, %v1013_v9 }
 0x713   : > { %1546 = vmatmul.mubr.bf16.vlgmr.msra.gmra.mrb[12].mxu1 %v1014_v10 }
 0x7e6   : > { %v1119_v0 = vpop.f32.mrb[12].mxu1 }
 0x7e7   : > { %v1120_v12 = vadd.f32 %v1304_v11, %v1119_v0  ;;  %v1547_v13 = vpop.f32.mrb[13].mxu1 }
 0x7e8   : > { %v1122_v14 = vpop.f32.mrb[14].mxu1 }
 0x7e9   : > { %1125 = vst [vmem:[%s212_s20] sm:$0xff] %v1120_v12  ;;  %v1548_v15 = vpop.f32.mrb[15].mxu1 }
 0x7ea   : > { %1785 = shalt.err (!%p1782_p2)
}
 0x7eb   : > { %s1786_s8 = scalar_lea.hbm %s2141_s27, 128  ;;  %s1790_s10 = scalar_lea.hbm %s2188_s3, 256 }
 0x7ec   : > { %p1787_p13 = scmp.ne.s32.totalorder %s2141_s27, %s1786_s8  ;;  %p1791_p4 = scmp.lt.u32.totalorder %s2141_s27, %s2188_s3 }
 0x7ed   : > { %p1792_p5 = scmp.lt.u32.totalorder %s1790_s10, %s1786_s8  ;;  %p1794_p11 = scmp.lt.u32.totalorder %s1786_s8, %s2141_s27 }
 0x7ee   : > { %p1788_p6 = pnand %p1787_p13, %p2202_p0 }
 0x7ef   : > { %p1793_p8 = por %p1792_p5, %p1791_p4 }
 0x7f0   : > { %p1789_p10 = pneg %p1788_p6 }
 0x7f1   : > { %p1795_p1 = por %p1794_p11, %p1793_p8 }
 0x7f3   : > { %p1796_p3 = pnand %p1795_p1, %p1789_p10 }
 0x7f5   : > { %1799 = shalt.err (!%p1796_p3)
}
 0x7f6   : > { %1559 = dma.vmem_to_hbm [thread:$0]  (%p2202_p0), %s2143_s17, 128, %s2141_s27, %s1127_s16  }
 0x7f7 PF: > { %s1152_s28 = sand.u32 1, %s1830_s12   ;;  %p2203_p7 = scmp.ne.s32.totalorder %s2193_s19, 0 }
 0x7f8   : > { %p2204_p9 = scmp.ge.s32.totalorder %s1842_s15, 2  ;;  %s1153_s22 = scalar_lea.sflag [#allocation4], %s1152_s28 }
 0x7fa   : > { %p1573_p12 = pnand %p2204_p9, %p2203_p7 }
 0x7fc   : > { %1825 = dma.done.wait (!%p1573_p12), %s1153_s22, 128  }
 0x7fd   : > { %1827 = vsyncadd (!%p1573_p12), %s1153_s22, 4294967168  ;;  %p17_p2 = scmp.ge.s32.totalorder %s1982_s4, 4   ;;  %s2205_s12 = smov %s1834_s13 }
 0x7fe   : > { %s2206_s13 = smov %s1838_s14  ;;  %s2207_s14 = smov %s1998_s7 }
 0x7ff   : > { %s2208_s15 = smov %s1982_s4  ;;  %19 = sbr.rel (!%p17_p2) target bundleno = 6 (0x6), region = 92 }
 0x806   :  { %1158 = vsyncpa [#allocation3], 1 }
 0x807   :  { %1160 = vsyncpa [#allocation3 + $0x1], 1 }
 0x808   :  { %1161 = vsyncpa [#allocation6], 1 }
 0x809   :  { %1162 = vsyncpa [#allocation4], 1 }
 0x80a   :  { %1164 = vsyncpa [#allocation4 + $0x1], 1 }

</bundles_post_ra>
